<compile_context>
chip_gen: v7x
topology: tpu7x:2x2x1
jax: 0.10.0
libtpu: 0.0.40
codegen_flags: <defaults>
</compile_context>

<pallas_src>
import jax
import jax.numpy as jnp
import numpy as np
from jax import lax
from jax.experimental import pallas as pl
from jax.experimental.pallas import tpu as pltpu


# CNN_3D_old layer configs: (Cin, Cout, kernel(d,h,w), stride(d,h,w), pad(d,h,w))
_CONV_CFGS = (
    (1, 20, (3, 3, 3), (1, 1, 1), (1, 0, 0)),   # conv1_w
    (20, 2, (3, 3, 3), (2, 2, 2), (1, 1, 1)),   # conv2_w
    (2, 35, (3, 1, 1), (1, 1, 1), (0, 0, 0)),   # conv3_w
    (35, 2, (2, 1, 1), (2, 2, 2), (0, 0, 0)),   # conv4_w
    (2, 35, (3, 1, 1), (1, 1, 1), (1, 0, 0)),   # conv5_w
    (35, 4, (3, 1, 1), (2, 2, 2), (1, 0, 0)),   # conv6_w
)


def _out_dim(n, k, s, p):
    return (n + 2 * p - k) // s + 1


# ---------------------------------------------------------------------------
# Fused kernel: one program = one sample; everything stays in VMEM.
# ---------------------------------------------------------------------------
def _fused_cnn3d_kernel(x_ref, *refs):
    n_layers = len(_CONV_CFGS)
    layer_refs = refs[: 3 * n_layers]
    wfc_ref = refs[3 * n_layers]
    bfc_ref = refs[3 * n_layers + 1]
    out_ref = refs[3 * n_layers + 2]

    a = x_ref[...]                                     # (D, 5*5), Cin = 1
    for l in range(n_layers):
        s_ref, h_ref, b_ref = layer_refs[3 * l: 3 * l + 3]
        acc = None
        for kd in range(s_ref.shape[0]):               # 2 or 3 depth taps
            t = jnp.dot(s_ref[kd], a, preferred_element_type=jnp.float32)
            c = jnp.dot(t, h_ref[kd], preferred_element_type=jnp.float32)
            acc = c if acc is None else acc + c
        a = jnp.maximum(acc + b_ref[...], 0.0)         # bias + ReLU (f32 VPU)

    # Fused classifier: a is (D6, 4); torch flatten order is baked into wfc_k.
    logits = bfc_ref[...]                              # (1, num_classes)
    for d in range(a.shape[0]):
        logits = logits + jnp.dot(a[d:d + 1, :], wfc_ref[d],
                                  preferred_element_type=jnp.float32)
    out_ref[...] = logits


# ---------------------------------------------------------------------------
# Host-side folding of Conv3d weights into (depth-selection, spatial-fold, bias).
# ---------------------------------------------------------------------------
def _fold_conv(w_dhwio, b, dhw_in, stride, pad):
    kd_, kh_, kw_, cin, cout = w_dhwio.shape
    din, hin, win = dhw_in
    sd, sh, sw = stride
    pd, ph, pw = pad
    dout = _out_dim(din, kd_, sd, pd)
    hout = _out_dim(hin, kh_, sh, ph)
    wout = _out_dim(win, kw_, sw, pw)
    w = np.asarray(w_dhwio, np.float32)

    sel = np.zeros((kd_, dout, din), np.float32)       # depth stride + zero-pad
    for kd in range(kd_):
        for do in range(dout):
            di = sd * do + kd - pd
            if 0 <= di < din:
                sel[kd, do, di] = 1.0

    fold = np.zeros((kd_, hin * win * cin, hout * wout * cout), np.float32)
    for kd in range(kd_):
        for ho in range(hout):
            for kh in range(kh_):
                hi = sh * ho + kh - ph
                if not (0 <= hi < hin):
                    continue
                for wo in range(wout):
                    for kw in range(kw_):
                        wi = sw * wo + kw - pw
                        if not (0 <= wi < win):
                            continue
                        r0 = (hi * win + wi) * cin
                        c0 = (ho * wout + wo) * cout
                        fold[kd, r0:r0 + cin, c0:c0 + cout] += w[kd, kh, kw]

    brow = np.tile(np.asarray(b, np.float32), hout * wout)[None, :]
    return ((jnp.asarray(sel), jnp.asarray(fold), jnp.asarray(brow)),
            (dout, hout, wout))


def init_params(key, spectral, num_classes):
    keys = jax.random.split(key, 2 * len(_CONV_CFGS) + 2)
    convs = []
    for i, (cin, cout, k, s, p) in enumerate(_CONV_CFGS):
        w = 0.1 * jax.random.normal(keys[2 * i],
                                    (k[0], k[1], k[2], cin, cout), jnp.float32)
        b = 0.05 * jax.random.normal(keys[2 * i + 1], (cout,), jnp.float32)
        convs.append((w, b, s, p))
    d, h, w_ = spectral, 5, 5
    for (cin, cout, k, s, p) in _CONV_CFGS:
        d, h, w_ = (_out_dim(d, k[0], s[0], p[0]),
                    _out_dim(h, k[1], s[1], p[1]),
                    _out_dim(w_, k[2], s[2], p[2]))
    fc_in = _CONV_CFGS[-1][1] * d * h * w_
    w_fc = 0.1 * jax.random.normal(keys[-2], (fc_in, num_classes), jnp.float32)
    b_fc = 0.05 * jax.random.normal(keys[-1], (1, num_classes), jnp.float32)
    return {"convs": convs, "w_fc": w_fc, "b_fc": b_fc}


def prepare_kernel_params(params, spectral):
    dhw = (spectral, 5, 5)
    layers = []
    for (w, b, s, p) in params["convs"]:
        (sel, fold, brow), dhw = _fold_conv(w, b, dhw, s, p)
        layers.append((sel, fold, brow))
    d6, h6, w6 = dhw
    assert (h6, w6) == (1, 1)
    cout_last = _CONV_CFGS[-1][1]
    num_classes = params["w_fc"].shape[1]
    # torch flattens (C, D, H, W): feature index = co*d6 + d  -> regroup to (d6, C, classes)
    w_fc_k = jnp.transpose(
        params["w_fc"].reshape(cout_last, d6, num_classes), (1, 0, 2))
    return {"layers": layers, "w_fc_k": w_fc_k, "b_fc": params["b_fc"]}


# ---------------------------------------------------------------------------
# Forward pass: single pallas_call, grid=(N,) "parallel".
# ---------------------------------------------------------------------------
def cnn3d_forward(x, kparams):
    n, d, h, w = x.shape
    assert (h, w) == (5, 5)
    x2 = x.reshape(n, d, h * w)                        # (N, D, 25)
    num_classes = kparams["b_fc"].shape[1]

    weight_arrays = []
    for (sel, fold, brow) in kparams["layers"]:
        weight_arrays += [sel, fold, brow]
    weight_arrays += [kparams["w_fc_k"], kparams["b_fc"]]

    in_specs = [pl.BlockSpec((None, d, h * w), lambda i: (i, 0, 0))]
    for arr in weight_arrays:                          # VMEM-resident weights
        in_specs.append(
            pl.BlockSpec(arr.shape, lambda i, _nd=arr.ndim: (0,) * _nd))

    out = pl.pallas_call(
        _fused_cnn3d_kernel,
        out_shape=jax.ShapeDtypeStruct((n, 1, num_classes), jnp.float32),
        grid=(n,),
        in_specs=in_specs,
        out_specs=pl.BlockSpec((None, 1, num_classes), lambda i: (i, 0, 0)),
        compiler_params=pltpu.CompilerParams(
            dimension_semantics=("parallel",)),
    )(x2, *weight_arrays)
    return out.reshape(n, num_classes)


# ---------------------------------------------------------------------------
# Pure-JAX reference (lax.conv_general_dilated, torch semantics).
# ---------------------------------------------------------------------------
def reference_forward(x, params):
    n, d = x.shape[0], x.shape[1]
    a = x.reshape(n, d, 5, 5, 1)                       # unsqueeze -> NDHWC, C=1
    for (w, b, s, p) in params["convs"]:
        dn = lax.conv_dimension_numbers(a.shape, w.shape,
                                        ("NDHWC", "DHWIO", "NDHWC"))
        y = lax.conv_general_dilated(
            a, w, window_strides=s,
            padding=[(p[0], p[0]), (p[1], p[1]), (p[2], p[2])],
            dimension_numbers=dn)
        a = jnp.maximum(y + b.reshape(1, 1, 1, 1, -1), 0.0)
    feat = jnp.transpose(a, (0, 4, 1, 2, 3)).reshape(n, -1)   # torch (C,D,H,W) flatten
    return feat @ params["w_fc"] + params["b_fc"]


if __name__ == "__main__":
    key = jax.random.PRNGKey(0)
    kx, kp = jax.random.split(key)

    N, SPECTRAL, H, W = 4, 16, 5, 5          # module input: [N, spectral, 5, 5]
    NUM_CLASSES = 10

    x = jax.random.normal(kx, (N, SPECTRAL, H, W), dtype=jnp.float32)
    params = init_params(kp, SPECTRAL, NUM_CLASSES)
    kparams = prepare_kernel_params(params, SPECTRAL)

    out = jax.block_until_ready(cnn3d_forward(x, kparams))
    ref = jax.block_until_ready(reference_forward(x, params))

    assert out.shape == (N, NUM_CLASSES)
    np.testing.assert_allclose(np.asarray(out), np.asarray(ref),
                               rtol=5e-4, atol=5e-4)
    print("KERNEL_OK")
</pallas_src>

<mosaic_0001>
module attributes {stable_mosaic.version = 11 : i64} {
  func.func @_fused_cnn3d_kernel(%arg0: i32, %arg1: memref<1x16x25xf32, #tpu.memory_space<vmem>>, %arg2: memref<3x16x16xf32, #tpu.memory_space<vmem>>, %arg3: memref<3x25x180xf32, #tpu.memory_space<vmem>>, %arg4: memref<1x180xf32, #tpu.memory_space<vmem>>, %arg5: memref<3x8x16xf32, #tpu.memory_space<vmem>>, %arg6: memref<3x180x8xf32, #tpu.memory_space<vmem>>, %arg7: memref<1x8xf32, #tpu.memory_space<vmem>>, %arg8: memref<3x6x8xf32, #tpu.memory_space<vmem>>, %arg9: memref<3x8x140xf32, #tpu.memory_space<vmem>>, %arg10: memref<1x140xf32, #tpu.memory_space<vmem>>, %arg11: memref<2x3x6xf32, #tpu.memory_space<vmem>>, %arg12: memref<2x140x2xf32, #tpu.memory_space<vmem>>, %arg13: memref<1x2xf32, #tpu.memory_space<vmem>>, %arg14: memref<3x3x3xf32, #tpu.memory_space<vmem>>, %arg15: memref<3x2x35xf32, #tpu.memory_space<vmem>>, %arg16: memref<1x35xf32, #tpu.memory_space<vmem>>, %arg17: memref<3x2x3xf32, #tpu.memory_space<vmem>>, %arg18: memref<3x35x4xf32, #tpu.memory_space<vmem>>, %arg19: memref<1x4xf32, #tpu.memory_space<vmem>>, %arg20: memref<2x4x10xf32, #tpu.memory_space<vmem>>, %arg21: memref<1x10xf32, #tpu.memory_space<vmem>>, %arg22: memref<1x1x10xf32, #tpu.memory_space<vmem>>) attributes {dimension_semantics = [#tpu.dimension_semantics<parallel>], iteration_bounds = array<i64: 4>, scalar_prefetch = 0 : i64, scratch_operands = 0 : i64, tpu.core_type = #tpu.core_type<tc>, window_params = [{transform_indices = @transform_0, window_bounds = array<i64: 1, 16, 25>}, {pipeline_mode = #tpu.pipeline_mode<synchronous>, transform_indices = @transform_1, window_bounds = array<i64: 3, 16, 16>}, {pipeline_mode = #tpu.pipeline_mode<synchronous>, transform_indices = @transform_2, window_bounds = array<i64: 3, 25, 180>}, {pipeline_mode = #tpu.pipeline_mode<synchronous>, transform_indices = @transform_3, window_bounds = array<i64: 1, 180>}, {pipeline_mode = #tpu.pipeline_mode<synchronous>, transform_indices = @transform_4, window_bounds = array<i64: 3, 8, 16>}, {pipeline_mode = #tpu.pipeline_mode<synchronous>, transform_indices = @transform_5, window_bounds = array<i64: 3, 180, 8>}, {pipeline_mode = #tpu.pipeline_mode<synchronous>, transform_indices = @transform_6, window_bounds = array<i64: 1, 8>}, {pipeline_mode = #tpu.pipeline_mode<synchronous>, transform_indices = @transform_7, window_bounds = array<i64: 3, 6, 8>}, {pipeline_mode = #tpu.pipeline_mode<synchronous>, transform_indices = @transform_8, window_bounds = array<i64: 3, 8, 140>}, {pipeline_mode = #tpu.pipeline_mode<synchronous>, transform_indices = @transform_9, window_bounds = array<i64: 1, 140>}, {pipeline_mode = #tpu.pipeline_mode<synchronous>, transform_indices = @transform_10, window_bounds = array<i64: 2, 3, 6>}, {pipeline_mode = #tpu.pipeline_mode<synchronous>, transform_indices = @transform_11, window_bounds = array<i64: 2, 140, 2>}, {pipeline_mode = #tpu.pipeline_mode<synchronous>, transform_indices = @transform_12, window_bounds = array<i64: 1, 2>}, {pipeline_mode = #tpu.pipeline_mode<synchronous>, transform_indices = @transform_13, window_bounds = array<i64: 3, 3, 3>}, {pipeline_mode = #tpu.pipeline_mode<synchronous>, transform_indices = @transform_14, window_bounds = array<i64: 3, 2, 35>}, {pipeline_mode = #tpu.pipeline_mode<synchronous>, transform_indices = @transform_15, window_bounds = array<i64: 1, 35>}, {pipeline_mode = #tpu.pipeline_mode<synchronous>, transform_indices = @transform_16, window_bounds = array<i64: 3, 2, 3>}, {pipeline_mode = #tpu.pipeline_mode<synchronous>, transform_indices = @transform_17, window_bounds = array<i64: 3, 35, 4>}, {pipeline_mode = #tpu.pipeline_mode<synchronous>, transform_indices = @transform_18, window_bounds = array<i64: 1, 4>}, {pipeline_mode = #tpu.pipeline_mode<synchronous>, transform_indices = @transform_19, window_bounds = array<i64: 2, 4, 10>}, {pipeline_mode = #tpu.pipeline_mode<synchronous>, transform_indices = @transform_20, window_bounds = array<i64: 1, 10>}, {transform_indices = @transform_21, window_bounds = array<i64: 1, 1, 10>}]} {
    %c0 = arith.constant 0 : index
    %c0_0 = arith.constant 0 : index
    %c0_1 = arith.constant 0 : index
    %0 = vector.load %arg1[%c0, %c0_0, %c0_1] : memref<1x16x25xf32, #tpu.memory_space<vmem>>, vector<1x16x25xf32>
    %1 = vector.shape_cast %0 : vector<1x16x25xf32> to vector<16x25xf32>
    %c0_2 = arith.constant 0 : index
    %c0_3 = arith.constant 0 : index
    %c0_4 = arith.constant 0 : index
    %2 = vector.load %arg2[%c0_2, %c0_3, %c0_4] : memref<3x16x16xf32, #tpu.memory_space<vmem>>, vector<1x16x16xf32>
    %3 = vector.shape_cast %2 : vector<1x16x16xf32> to vector<16x16xf32>
    %cst = arith.constant dense<0.000000e+00> : vector<16x25xf32>
    %4 = tpu.matmul %3, %1, %cst {dimension_numbers = #tpu.dot_dimension_numbers<[1], [0], [0], [1], [0, 0, 1, 1], [], []>} : vector<16x16xf32>, vector<16x25xf32>, vector<16x25xf32> -> vector<16x25xf32>
    %c0_5 = arith.constant 0 : index
    %c0_6 = arith.constant 0 : index
    %c0_7 = arith.constant 0 : index
    %5 = vector.load %arg3[%c0_5, %c0_6, %c0_7] : memref<3x25x180xf32, #tpu.memory_space<vmem>>, vector<1x25x180xf32>
    %6 = vector.shape_cast %5 : vector<1x25x180xf32> to vector<25x180xf32>
    %cst_8 = arith.constant dense<0.000000e+00> : vector<16x180xf32>
    %7 = tpu.matmul %4, %6, %cst_8 {dimension_numbers = #tpu.dot_dimension_numbers<[1], [0], [0], [1], [0, 0, 1, 1], [], []>} : vector<16x25xf32>, vector<25x180xf32>, vector<16x180xf32> -> vector<16x180xf32>
    %c1 = arith.constant 1 : index
    %c0_9 = arith.constant 0 : index
    %c0_10 = arith.constant 0 : index
    %8 = vector.load %arg2[%c1, %c0_9, %c0_10] : memref<3x16x16xf32, #tpu.memory_space<vmem>>, vector<1x16x16xf32>
    %9 = vector.shape_cast %8 : vector<1x16x16xf32> to vector<16x16xf32>
    %cst_11 = arith.constant dense<0.000000e+00> : vector<16x25xf32>
    %10 = tpu.matmul %9, %1, %cst_11 {dimension_numbers = #tpu.dot_dimension_numbers<[1], [0], [0], [1], [0, 0, 1, 1], [], []>} : vector<16x16xf32>, vector<16x25xf32>, vector<16x25xf32> -> vector<16x25xf32>
    %c1_12 = arith.constant 1 : index
    %c0_13 = arith.constant 0 : index
    %c0_14 = arith.constant 0 : index
    %11 = vector.load %arg3[%c1_12, %c0_13, %c0_14] : memref<3x25x180xf32, #tpu.memory_space<vmem>>, vector<1x25x180xf32>
    %12 = vector.shape_cast %11 : vector<1x25x180xf32> to vector<25x180xf32>
    %cst_15 = arith.constant dense<0.000000e+00> : vector<16x180xf32>
    %13 = tpu.matmul %10, %12, %cst_15 {dimension_numbers = #tpu.dot_dimension_numbers<[1], [0], [0], [1], [0, 0, 1, 1], [], []>} : vector<16x25xf32>, vector<25x180xf32>, vector<16x180xf32> -> vector<16x180xf32>
    %14 = arith.addf %7, %13 : vector<16x180xf32>
    %c2 = arith.constant 2 : index
    %c0_16 = arith.constant 0 : index
    %c0_17 = arith.constant 0 : index
    %15 = vector.load %arg2[%c2, %c0_16, %c0_17] : memref<3x16x16xf32, #tpu.memory_space<vmem>>, vector<1x16x16xf32>
    %16 = vector.shape_cast %15 : vector<1x16x16xf32> to vector<16x16xf32>
    %cst_18 = arith.constant dense<0.000000e+00> : vector<16x25xf32>
    %17 = tpu.matmul %16, %1, %cst_18 {dimension_numbers = #tpu.dot_dimension_numbers<[1], [0], [0], [1], [0, 0, 1, 1], [], []>} : vector<16x16xf32>, vector<16x25xf32>, vector<16x25xf32> -> vector<16x25xf32>
    %c2_19 = arith.constant 2 : index
    %c0_20 = arith.constant 0 : index
    %c0_21 = arith.constant 0 : index
    %18 = vector.load %arg3[%c2_19, %c0_20, %c0_21] : memref<3x25x180xf32, #tpu.memory_space<vmem>>, vector<1x25x180xf32>
    %19 = vector.shape_cast %18 : vector<1x25x180xf32> to vector<25x180xf32>
    %cst_22 = arith.constant dense<0.000000e+00> : vector<16x180xf32>
    %20 = tpu.matmul %17, %19, %cst_22 {dimension_numbers = #tpu.dot_dimension_numbers<[1], [0], [0], [1], [0, 0, 1, 1], [], []>} : vector<16x25xf32>, vector<25x180xf32>, vector<16x180xf32> -> vector<16x180xf32>
    %21 = arith.addf %14, %20 : vector<16x180xf32>
    %c0_23 = arith.constant 0 : index
    %c0_24 = arith.constant 0 : index
    %22 = vector.load %arg4[%c0_23, %c0_24] : memref<1x180xf32, #tpu.memory_space<vmem>>, vector<1x180xf32>
    %23 = vector.broadcast %22 : vector<1x180xf32> to vector<16x180xf32>
    %24 = arith.addf %21, %23 : vector<16x180xf32>
    %cst_25 = arith.constant 0.000000e+00 : f32
    %25 = vector.broadcast %cst_25 : f32 to vector<16x180xf32>
    %26 = arith.maximumf %24, %25 : vector<16x180xf32>
    %c0_26 = arith.constant 0 : index
    %c0_27 = arith.constant 0 : index
    %c0_28 = arith.constant 0 : index
    %27 = vector.load %arg5[%c0_26, %c0_27, %c0_28] : memref<3x8x16xf32, #tpu.memory_space<vmem>>, vector<1x8x16xf32>
    %28 = vector.shape_cast %27 : vector<1x8x16xf32> to vector<8x16xf32>
    %cst_29 = arith.constant dense<0.000000e+00> : vector<8x180xf32>
    %29 = tpu.matmul %28, %26, %cst_29 {dimension_numbers = #tpu.dot_dimension_numbers<[1], [0], [0], [1], [0, 0, 1, 1], [], []>} : vector<8x16xf32>, vector<16x180xf32>, vector<8x180xf32> -> vector<8x180xf32>
    %c0_30 = arith.constant 0 : index
    %c0_31 = arith.constant 0 : index
    %c0_32 = arith.constant 0 : index
    %30 = vector.load %arg6[%c0_30, %c0_31, %c0_32] : memref<3x180x8xf32, #tpu.memory_space<vmem>>, vector<1x180x8xf32>
    %31 = vector.shape_cast %30 : vector<1x180x8xf32> to vector<180x8xf32>
    %cst_33 = arith.constant dense<0.000000e+00> : vector<8x8xf32>
    %32 = tpu.matmul %29, %31, %cst_33 {dimension_numbers = #tpu.dot_dimension_numbers<[1], [0], [0], [1], [0, 0, 1, 1], [], []>} : vector<8x180xf32>, vector<180x8xf32>, vector<8x8xf32> -> vector<8x8xf32>
    %c1_34 = arith.constant 1 : index
    %c0_35 = arith.constant 0 : index
    %c0_36 = arith.constant 0 : index
    %33 = vector.load %arg5[%c1_34, %c0_35, %c0_36] : memref<3x8x16xf32, #tpu.memory_space<vmem>>, vector<1x8x16xf32>
    %34 = vector.shape_cast %33 : vector<1x8x16xf32> to vector<8x16xf32>
    %cst_37 = arith.constant dense<0.000000e+00> : vector<8x180xf32>
    %35 = tpu.matmul %34, %26, %cst_37 {dimension_numbers = #tpu.dot_dimension_numbers<[1], [0], [0], [1], [0, 0, 1, 1], [], []>} : vector<8x16xf32>, vector<16x180xf32>, vector<8x180xf32> -> vector<8x180xf32>
    %c1_38 = arith.constant 1 : index
    %c0_39 = arith.constant 0 : index
    %c0_40 = arith.constant 0 : index
    %36 = vector.load %arg6[%c1_38, %c0_39, %c0_40] : memref<3x180x8xf32, #tpu.memory_space<vmem>>, vector<1x180x8xf32>
    %37 = vector.shape_cast %36 : vector<1x180x8xf32> to vector<180x8xf32>
    %cst_41 = arith.constant dense<0.000000e+00> : vector<8x8xf32>
    %38 = tpu.matmul %35, %37, %cst_41 {dimension_numbers = #tpu.dot_dimension_numbers<[1], [0], [0], [1], [0, 0, 1, 1], [], []>} : vector<8x180xf32>, vector<180x8xf32>, vector<8x8xf32> -> vector<8x8xf32>
    %39 = arith.addf %32, %38 : vector<8x8xf32>
    %c2_42 = arith.constant 2 : index
    %c0_43 = arith.constant 0 : index
    %c0_44 = arith.constant 0 : index
    %40 = vector.load %arg5[%c2_42, %c0_43, %c0_44] : memref<3x8x16xf32, #tpu.memory_space<vmem>>, vector<1x8x16xf32>
    %41 = vector.shape_cast %40 : vector<1x8x16xf32> to vector<8x16xf32>
    %cst_45 = arith.constant dense<0.000000e+00> : vector<8x180xf32>
    %42 = tpu.matmul %41, %26, %cst_45 {dimension_numbers = #tpu.dot_dimension_numbers<[1], [0], [0], [1], [0, 0, 1, 1], [], []>} : vector<8x16xf32>, vector<16x180xf32>, vector<8x180xf32> -> vector<8x180xf32>
    %c2_46 = arith.constant 2 : index
    %c0_47 = arith.constant 0 : index
    %c0_48 = arith.constant 0 : index
    %43 = vector.load %arg6[%c2_46, %c0_47, %c0_48] : memref<3x180x8xf32, #tpu.memory_space<vmem>>, vector<1x180x8xf32>
    %44 = vector.shape_cast %43 : vector<1x180x8xf32> to vector<180x8xf32>
    %cst_49 = arith.constant dense<0.000000e+00> : vector<8x8xf32>
    %45 = tpu.matmul %42, %44, %cst_49 {dimension_numbers = #tpu.dot_dimension_numbers<[1], [0], [0], [1], [0, 0, 1, 1], [], []>} : vector<8x180xf32>, vector<180x8xf32>, vector<8x8xf32> -> vector<8x8xf32>
    %46 = arith.addf %39, %45 : vector<8x8xf32>
    %c0_50 = arith.constant 0 : index
    %c0_51 = arith.constant 0 : index
    %47 = vector.load %arg7[%c0_50, %c0_51] : memref<1x8xf32, #tpu.memory_space<vmem>>, vector<1x8xf32>
    %48 = vector.broadcast %47 : vector<1x8xf32> to vector<8x8xf32>
    %49 = arith.addf %46, %48 : vector<8x8xf32>
    %cst_52 = arith.constant 0.000000e+00 : f32
    %50 = vector.broadcast %cst_52 : f32 to vector<8x8xf32>
    %51 = arith.maximumf %49, %50 : vector<8x8xf32>
    %c0_53 = arith.constant 0 : index
    %c0_54 = arith.constant 0 : index
    %c0_55 = arith.constant 0 : index
    %52 = vector.load %arg8[%c0_53, %c0_54, %c0_55] : memref<3x6x8xf32, #tpu.memory_space<vmem>>, vector<1x6x8xf32>
    %53 = vector.shape_cast %52 : vector<1x6x8xf32> to vector<6x8xf32>
    %cst_56 = arith.constant dense<0.000000e+00> : vector<6x8xf32>
    %54 = tpu.matmul %53, %51, %cst_56 {dimension_numbers = #tpu.dot_dimension_numbers<[1], [0], [0], [1], [0, 0, 1, 1], [], []>} : vector<6x8xf32>, vector<8x8xf32>, vector<6x8xf32> -> vector<6x8xf32>
    %c0_57 = arith.constant 0 : index
    %c0_58 = arith.constant 0 : index
    %c0_59 = arith.constant 0 : index
    %55 = vector.load %arg9[%c0_57, %c0_58, %c0_59] : memref<3x8x140xf32, #tpu.memory_space<vmem>>, vector<1x8x140xf32>
    %56 = vector.shape_cast %55 : vector<1x8x140xf32> to vector<8x140xf32>
    %cst_60 = arith.constant dense<0.000000e+00> : vector<6x140xf32>
    %57 = tpu.matmul %54, %56, %cst_60 {dimension_numbers = #tpu.dot_dimension_numbers<[1], [0], [0], [1], [0, 0, 1, 1], [], []>} : vector<6x8xf32>, vector<8x140xf32>, vector<6x140xf32> -> vector<6x140xf32>
    %c1_61 = arith.constant 1 : index
    %c0_62 = arith.constant 0 : index
    %c0_63 = arith.constant 0 : index
    %58 = vector.load %arg8[%c1_61, %c0_62, %c0_63] : memref<3x6x8xf32, #tpu.memory_space<vmem>>, vector<1x6x8xf32>
    %59 = vector.shape_cast %58 : vector<1x6x8xf32> to vector<6x8xf32>
    %cst_64 = arith.constant dense<0.000000e+00> : vector<6x8xf32>
    %60 = tpu.matmul %59, %51, %cst_64 {dimension_numbers = #tpu.dot_dimension_numbers<[1], [0], [0], [1], [0, 0, 1, 1], [], []>} : vector<6x8xf32>, vector<8x8xf32>, vector<6x8xf32> -> vector<6x8xf32>
    %c1_65 = arith.constant 1 : index
    %c0_66 = arith.constant 0 : index
    %c0_67 = arith.constant 0 : index
    %61 = vector.load %arg9[%c1_65, %c0_66, %c0_67] : memref<3x8x140xf32, #tpu.memory_space<vmem>>, vector<1x8x140xf32>
    %62 = vector.shape_cast %61 : vector<1x8x140xf32> to vector<8x140xf32>
    %cst_68 = arith.constant dense<0.000000e+00> : vector<6x140xf32>
    %63 = tpu.matmul %60, %62, %cst_68 {dimension_numbers = #tpu.dot_dimension_numbers<[1], [0], [0], [1], [0, 0, 1, 1], [], []>} : vector<6x8xf32>, vector<8x140xf32>, vector<6x140xf32> -> vector<6x140xf32>
    %64 = arith.addf %57, %63 : vector<6x140xf32>
    %c2_69 = arith.constant 2 : index
    %c0_70 = arith.constant 0 : index
    %c0_71 = arith.constant 0 : index
    %65 = vector.load %arg8[%c2_69, %c0_70, %c0_71] : memref<3x6x8xf32, #tpu.memory_space<vmem>>, vector<1x6x8xf32>
    %66 = vector.shape_cast %65 : vector<1x6x8xf32> to vector<6x8xf32>
    %cst_72 = arith.constant dense<0.000000e+00> : vector<6x8xf32>
    %67 = tpu.matmul %66, %51, %cst_72 {dimension_numbers = #tpu.dot_dimension_numbers<[1], [0], [0], [1], [0, 0, 1, 1], [], []>} : vector<6x8xf32>, vector<8x8xf32>, vector<6x8xf32> -> vector<6x8xf32>
    %c2_73 = arith.constant 2 : index
    %c0_74 = arith.constant 0 : index
    %c0_75 = arith.constant 0 : index
    %68 = vector.load %arg9[%c2_73, %c0_74, %c0_75] : memref<3x8x140xf32, #tpu.memory_space<vmem>>, vector<1x8x140xf32>
    %69 = vector.shape_cast %68 : vector<1x8x140xf32> to vector<8x140xf32>
    %cst_76 = arith.constant dense<0.000000e+00> : vector<6x140xf32>
    %70 = tpu.matmul %67, %69, %cst_76 {dimension_numbers = #tpu.dot_dimension_numbers<[1], [0], [0], [1], [0, 0, 1, 1], [], []>} : vector<6x8xf32>, vector<8x140xf32>, vector<6x140xf32> -> vector<6x140xf32>
    %71 = arith.addf %64, %70 : vector<6x140xf32>
    %c0_77 = arith.constant 0 : index
    %c0_78 = arith.constant 0 : index
    %72 = vector.load %arg10[%c0_77, %c0_78] : memref<1x140xf32, #tpu.memory_space<vmem>>, vector<1x140xf32>
    %73 = vector.broadcast %72 : vector<1x140xf32> to vector<6x140xf32>
    %74 = arith.addf %71, %73 : vector<6x140xf32>
    %cst_79 = arith.constant 0.000000e+00 : f32
    %75 = vector.broadcast %cst_79 : f32 to vector<6x140xf32>
    %76 = arith.maximumf %74, %75 : vector<6x140xf32>
    %c0_80 = arith.constant 0 : index
    %c0_81 = arith.constant 0 : index
    %c0_82 = arith.constant 0 : index
    %77 = vector.load %arg11[%c0_80, %c0_81, %c0_82] : memref<2x3x6xf32, #tpu.memory_space<vmem>>, vector<1x3x6xf32>
    %78 = vector.shape_cast %77 : vector<1x3x6xf32> to vector<3x6xf32>
    %cst_83 = arith.constant dense<0.000000e+00> : vector<3x140xf32>
    %79 = tpu.matmul %78, %76, %cst_83 {dimension_numbers = #tpu.dot_dimension_numbers<[1], [0], [0], [1], [0, 0, 1, 1], [], []>} : vector<3x6xf32>, vector<6x140xf32>, vector<3x140xf32> -> vector<3x140xf32>
    %c0_84 = arith.constant 0 : index
    %c0_85 = arith.constant 0 : index
    %c0_86 = arith.constant 0 : index
    %80 = vector.load %arg12[%c0_84, %c0_85, %c0_86] : memref<2x140x2xf32, #tpu.memory_space<vmem>>, vector<1x140x2xf32>
    %81 = vector.shape_cast %80 : vector<1x140x2xf32> to vector<140x2xf32>
    %cst_87 = arith.constant dense<0.000000e+00> : vector<3x2xf32>
    %82 = tpu.matmul %79, %81, %cst_87 {dimension_numbers = #tpu.dot_dimension_numbers<[1], [0], [0], [1], [0, 0, 1, 1], [], []>} : vector<3x140xf32>, vector<140x2xf32>, vector<3x2xf32> -> vector<3x2xf32>
    %c1_88 = arith.constant 1 : index
    %c0_89 = arith.constant 0 : index
    %c0_90 = arith.constant 0 : index
    %83 = vector.load %arg11[%c1_88, %c0_89, %c0_90] : memref<2x3x6xf32, #tpu.memory_space<vmem>>, vector<1x3x6xf32>
    %84 = vector.shape_cast %83 : vector<1x3x6xf32> to vector<3x6xf32>
    %cst_91 = arith.constant dense<0.000000e+00> : vector<3x140xf32>
    %85 = tpu.matmul %84, %76, %cst_91 {dimension_numbers = #tpu.dot_dimension_numbers<[1], [0], [0], [1], [0, 0, 1, 1], [], []>} : vector<3x6xf32>, vector<6x140xf32>, vector<3x140xf32> -> vector<3x140xf32>
    %c1_92 = arith.constant 1 : index
    %c0_93 = arith.constant 0 : index
    %c0_94 = arith.constant 0 : index
    %86 = vector.load %arg12[%c1_92, %c0_93, %c0_94] : memref<2x140x2xf32, #tpu.memory_space<vmem>>, vector<1x140x2xf32>
    %87 = vector.shape_cast %86 : vector<1x140x2xf32> to vector<140x2xf32>
    %cst_95 = arith.constant dense<0.000000e+00> : vector<3x2xf32>
    %88 = tpu.matmul %85, %87, %cst_95 {dimension_numbers = #tpu.dot_dimension_numbers<[1], [0], [0], [1], [0, 0, 1, 1], [], []>} : vector<3x140xf32>, vector<140x2xf32>, vector<3x2xf32> -> vector<3x2xf32>
    %89 = arith.addf %82, %88 : vector<3x2xf32>
    %c0_96 = arith.constant 0 : index
    %c0_97 = arith.constant 0 : index
    %90 = vector.load %arg13[%c0_96, %c0_97] : memref<1x2xf32, #tpu.memory_space<vmem>>, vector<1x2xf32>
    %91 = vector.broadcast %90 : vector<1x2xf32> to vector<3x2xf32>
    %92 = arith.addf %89, %91 : vector<3x2xf32>
    %cst_98 = arith.constant 0.000000e+00 : f32
    %93 = vector.broadcast %cst_98 : f32 to vector<3x2xf32>
    %94 = arith.maximumf %92, %93 : vector<3x2xf32>
    %c0_99 = arith.constant 0 : index
    %c0_100 = arith.constant 0 : index
    %c0_101 = arith.constant 0 : index
    %95 = vector.load %arg14[%c0_99, %c0_100, %c0_101] : memref<3x3x3xf32, #tpu.memory_space<vmem>>, vector<1x3x3xf32>
    %96 = vector.shape_cast %95 : vector<1x3x3xf32> to vector<3x3xf32>
    %cst_102 = arith.constant dense<0.000000e+00> : vector<3x2xf32>
    %97 = tpu.matmul %96, %94, %cst_102 {dimension_numbers = #tpu.dot_dimension_numbers<[1], [0], [0], [1], [0, 0, 1, 1], [], []>} : vector<3x3xf32>, vector<3x2xf32>, vector<3x2xf32> -> vector<3x2xf32>
    %c0_103 = arith.constant 0 : index
    %c0_104 = arith.constant 0 : index
    %c0_105 = arith.constant 0 : index
    %98 = vector.load %arg15[%c0_103, %c0_104, %c0_105] : memref<3x2x35xf32, #tpu.memory_space<vmem>>, vector<1x2x35xf32>
    %99 = vector.shape_cast %98 : vector<1x2x35xf32> to vector<2x35xf32>
    %cst_106 = arith.constant dense<0.000000e+00> : vector<3x35xf32>
    %100 = tpu.matmul %97, %99, %cst_106 {dimension_numbers = #tpu.dot_dimension_numbers<[1], [0], [0], [1], [0, 0, 1, 1], [], []>} : vector<3x2xf32>, vector<2x35xf32>, vector<3x35xf32> -> vector<3x35xf32>
    %c1_107 = arith.constant 1 : index
    %c0_108 = arith.constant 0 : index
    %c0_109 = arith.constant 0 : index
    %101 = vector.load %arg14[%c1_107, %c0_108, %c0_109] : memref<3x3x3xf32, #tpu.memory_space<vmem>>, vector<1x3x3xf32>
    %102 = vector.shape_cast %101 : vector<1x3x3xf32> to vector<3x3xf32>
    %cst_110 = arith.constant dense<0.000000e+00> : vector<3x2xf32>
    %103 = tpu.matmul %102, %94, %cst_110 {dimension_numbers = #tpu.dot_dimension_numbers<[1], [0], [0], [1], [0, 0, 1, 1], [], []>} : vector<3x3xf32>, vector<3x2xf32>, vector<3x2xf32> -> vector<3x2xf32>
    %c1_111 = arith.constant 1 : index
    %c0_112 = arith.constant 0 : index
    %c0_113 = arith.constant 0 : index
    %104 = vector.load %arg15[%c1_111, %c0_112, %c0_113] : memref<3x2x35xf32, #tpu.memory_space<vmem>>, vector<1x2x35xf32>
    %105 = vector.shape_cast %104 : vector<1x2x35xf32> to vector<2x35xf32>
    %cst_114 = arith.constant dense<0.000000e+00> : vector<3x35xf32>
    %106 = tpu.matmul %103, %105, %cst_114 {dimension_numbers = #tpu.dot_dimension_numbers<[1], [0], [0], [1], [0, 0, 1, 1], [], []>} : vector<3x2xf32>, vector<2x35xf32>, vector<3x35xf32> -> vector<3x35xf32>
    %107 = arith.addf %100, %106 : vector<3x35xf32>
    %c2_115 = arith.constant 2 : index
    %c0_116 = arith.constant 0 : index
    %c0_117 = arith.constant 0 : index
    %108 = vector.load %arg14[%c2_115, %c0_116, %c0_117] : memref<3x3x3xf32, #tpu.memory_space<vmem>>, vector<1x3x3xf32>
    %109 = vector.shape_cast %108 : vector<1x3x3xf32> to vector<3x3xf32>
    %cst_118 = arith.constant dense<0.000000e+00> : vector<3x2xf32>
    %110 = tpu.matmul %109, %94, %cst_118 {dimension_numbers = #tpu.dot_dimension_numbers<[1], [0], [0], [1], [0, 0, 1, 1], [], []>} : vector<3x3xf32>, vector<3x2xf32>, vector<3x2xf32> -> vector<3x2xf32>
    %c2_119 = arith.constant 2 : index
    %c0_120 = arith.constant 0 : index
    %c0_121 = arith.constant 0 : index
    %111 = vector.load %arg15[%c2_119, %c0_120, %c0_121] : memref<3x2x35xf32, #tpu.memory_space<vmem>>, vector<1x2x35xf32>
    %112 = vector.shape_cast %111 : vector<1x2x35xf32> to vector<2x35xf32>
    %cst_122 = arith.constant dense<0.000000e+00> : vector<3x35xf32>
    %113 = tpu.matmul %110, %112, %cst_122 {dimension_numbers = #tpu.dot_dimension_numbers<[1], [0], [0], [1], [0, 0, 1, 1], [], []>} : vector<3x2xf32>, vector<2x35xf32>, vector<3x35xf32> -> vector<3x35xf32>
    %114 = arith.addf %107, %113 : vector<3x35xf32>
    %c0_123 = arith.constant 0 : index
    %c0_124 = arith.constant 0 : index
    %115 = vector.load %arg16[%c0_123, %c0_124] : memref<1x35xf32, #tpu.memory_space<vmem>>, vector<1x35xf32>
    %116 = vector.broadcast %115 : vector<1x35xf32> to vector<3x35xf32>
    %117 = arith.addf %114, %116 : vector<3x35xf32>
    %cst_125 = arith.constant 0.000000e+00 : f32
    %118 = vector.broadcast %cst_125 : f32 to vector<3x35xf32>
    %119 = arith.maximumf %117, %118 : vector<3x35xf32>
    %c0_126 = arith.constant 0 : index
    %c0_127 = arith.constant 0 : index
    %c0_128 = arith.constant 0 : index
    %120 = vector.load %arg17[%c0_126, %c0_127, %c0_128] : memref<3x2x3xf32, #tpu.memory_space<vmem>>, vector<1x2x3xf32>
    %121 = vector.shape_cast %120 : vector<1x2x3xf32> to vector<2x3xf32>
    %cst_129 = arith.constant dense<0.000000e+00> : vector<2x35xf32>
    %122 = tpu.matmul %121, %119, %cst_129 {dimension_numbers = #tpu.dot_dimension_numbers<[1], [0], [0], [1], [0, 0, 1, 1], [], []>} : vector<2x3xf32>, vector<3x35xf32>, vector<2x35xf32> -> vector<2x35xf32>
    %c0_130 = arith.constant 0 : index
    %c0_131 = arith.constant 0 : index
    %c0_132 = arith.constant 0 : index
    %123 = vector.load %arg18[%c0_130, %c0_131, %c0_132] : memref<3x35x4xf32, #tpu.memory_space<vmem>>, vector<1x35x4xf32>
    %124 = vector.shape_cast %123 : vector<1x35x4xf32> to vector<35x4xf32>
    %cst_133 = arith.constant dense<0.000000e+00> : vector<2x4xf32>
    %125 = tpu.matmul %122, %124, %cst_133 {dimension_numbers = #tpu.dot_dimension_numbers<[1], [0], [0], [1], [0, 0, 1, 1], [], []>} : vector<2x35xf32>, vector<35x4xf32>, vector<2x4xf32> -> vector<2x4xf32>
    %c1_134 = arith.constant 1 : index
    %c0_135 = arith.constant 0 : index
    %c0_136 = arith.constant 0 : index
    %126 = vector.load %arg17[%c1_134, %c0_135, %c0_136] : memref<3x2x3xf32, #tpu.memory_space<vmem>>, vector<1x2x3xf32>
    %127 = vector.shape_cast %126 : vector<1x2x3xf32> to vector<2x3xf32>
    %cst_137 = arith.constant dense<0.000000e+00> : vector<2x35xf32>
    %128 = tpu.matmul %127, %119, %cst_137 {dimension_numbers = #tpu.dot_dimension_numbers<[1], [0], [0], [1], [0, 0, 1, 1], [], []>} : vector<2x3xf32>, vector<3x35xf32>, vector<2x35xf32> -> vector<2x35xf32>
    %c1_138 = arith.constant 1 : index
    %c0_139 = arith.constant 0 : index
    %c0_140 = arith.constant 0 : index
    %129 = vector.load %arg18[%c1_138, %c0_139, %c0_140] : memref<3x35x4xf32, #tpu.memory_space<vmem>>, vector<1x35x4xf32>
    %130 = vector.shape_cast %129 : vector<1x35x4xf32> to vector<35x4xf32>
    %cst_141 = arith.constant dense<0.000000e+00> : vector<2x4xf32>
    %131 = tpu.matmul %128, %130, %cst_141 {dimension_numbers = #tpu.dot_dimension_numbers<[1], [0], [0], [1], [0, 0, 1, 1], [], []>} : vector<2x35xf32>, vector<35x4xf32>, vector<2x4xf32> -> vector<2x4xf32>
    %132 = arith.addf %125, %131 : vector<2x4xf32>
    %c2_142 = arith.constant 2 : index
    %c0_143 = arith.constant 0 : index
    %c0_144 = arith.constant 0 : index
    %133 = vector.load %arg17[%c2_142, %c0_143, %c0_144] : memref<3x2x3xf32, #tpu.memory_space<vmem>>, vector<1x2x3xf32>
    %134 = vector.shape_cast %133 : vector<1x2x3xf32> to vector<2x3xf32>
    %cst_145 = arith.constant dense<0.000000e+00> : vector<2x35xf32>
    %135 = tpu.matmul %134, %119, %cst_145 {dimension_numbers = #tpu.dot_dimension_numbers<[1], [0], [0], [1], [0, 0, 1, 1], [], []>} : vector<2x3xf32>, vector<3x35xf32>, vector<2x35xf32> -> vector<2x35xf32>
    %c2_146 = arith.constant 2 : index
    %c0_147 = arith.constant 0 : index
    %c0_148 = arith.constant 0 : index
    %136 = vector.load %arg18[%c2_146, %c0_147, %c0_148] : memref<3x35x4xf32, #tpu.memory_space<vmem>>, vector<1x35x4xf32>
    %137 = vector.shape_cast %136 : vector<1x35x4xf32> to vector<35x4xf32>
    %cst_149 = arith.constant dense<0.000000e+00> : vector<2x4xf32>
    %138 = tpu.matmul %135, %137, %cst_149 {dimension_numbers = #tpu.dot_dimension_numbers<[1], [0], [0], [1], [0, 0, 1, 1], [], []>} : vector<2x35xf32>, vector<35x4xf32>, vector<2x4xf32> -> vector<2x4xf32>
    %139 = arith.addf %132, %138 : vector<2x4xf32>
    %c0_150 = arith.constant 0 : index
    %c0_151 = arith.constant 0 : index
    %140 = vector.load %arg19[%c0_150, %c0_151] : memref<1x4xf32, #tpu.memory_space<vmem>>, vector<1x4xf32>
    %141 = vector.broadcast %140 : vector<1x4xf32> to vector<2x4xf32>
    %142 = arith.addf %139, %141 : vector<2x4xf32>
    %cst_152 = arith.constant 0.000000e+00 : f32
    %143 = vector.broadcast %cst_152 : f32 to vector<2x4xf32>
    %144 = arith.maximumf %142, %143 : vector<2x4xf32>
    %c0_153 = arith.constant 0 : index
    %c0_154 = arith.constant 0 : index
    %145 = vector.load %arg21[%c0_153, %c0_154] : memref<1x10xf32, #tpu.memory_space<vmem>>, vector<1x10xf32>
    %146 = vector.extract_strided_slice %144 {offsets = [0, 0], sizes = [1, 4], strides = [1, 1]} : vector<2x4xf32> to vector<1x4xf32>
    %c0_155 = arith.constant 0 : index
    %c0_156 = arith.constant 0 : index
    %c0_157 = arith.constant 0 : index
    %147 = vector.load %arg20[%c0_155, %c0_156, %c0_157] : memref<2x4x10xf32, #tpu.memory_space<vmem>>, vector<1x4x10xf32>
    %148 = vector.shape_cast %147 : vector<1x4x10xf32> to vector<4x10xf32>
    %cst_158 = arith.constant dense<0.000000e+00> : vector<1x10xf32>
    %149 = tpu.matmul %146, %148, %cst_158 {dimension_numbers = #tpu.dot_dimension_numbers<[1], [0], [0], [1], [0, 0, 1, 1], [], []>} : vector<1x4xf32>, vector<4x10xf32>, vector<1x10xf32> -> vector<1x10xf32>
    %150 = arith.addf %145, %149 : vector<1x10xf32>
    %151 = vector.extract_strided_slice %144 {offsets = [1, 0], sizes = [1, 4], strides = [1, 1]} : vector<2x4xf32> to vector<1x4xf32>
    %c1_159 = arith.constant 1 : index
    %c0_160 = arith.constant 0 : index
    %c0_161 = arith.constant 0 : index
    %152 = vector.load %arg20[%c1_159, %c0_160, %c0_161] : memref<2x4x10xf32, #tpu.memory_space<vmem>>, vector<1x4x10xf32>
    %153 = vector.shape_cast %152 : vector<1x4x10xf32> to vector<4x10xf32>
    %cst_162 = arith.constant dense<0.000000e+00> : vector<1x10xf32>
    %154 = tpu.matmul %151, %153, %cst_162 {dimension_numbers = #tpu.dot_dimension_numbers<[1], [0], [0], [1], [0, 0, 1, 1], [], []>} : vector<1x4xf32>, vector<4x10xf32>, vector<1x10xf32> -> vector<1x10xf32>
    %155 = arith.addf %150, %154 : vector<1x10xf32>
    %c0_163 = arith.constant 0 : index
    %c0_164 = arith.constant 0 : index
    %c0_165 = arith.constant 0 : index
    %156 = vector.load %arg22[%c0_163, %c0_164, %c0_165] : memref<1x1x10xf32, #tpu.memory_space<vmem>>, vector<1x1x10xf32>
    %157 = vector.shape_cast %156 : vector<1x1x10xf32> to vector<1x10xf32>
    %158 = vector.shape_cast %155 : vector<1x10xf32> to vector<1x1x10xf32>
    tpu.vector_store %arg22[%c0_163, %c0_164, %c0_165], %158 {strides = array<i32>} : memref<1x1x10xf32, #tpu.memory_space<vmem>>, vector<1x1x10xf32>,
    return
  }
  func.func @transform_0(%arg0: i32) -> (i32, i32, i32) {
    %c0_i32 = arith.constant 0 : i32
    %c0_i32_0 = arith.constant 0 : i32
    %c0_i32_1 = arith.constant 0 : i32
    return %arg0, %c0_i32, %c0_i32_0 : i32, i32, i32
  }
  func.func @transform_1(%arg0: i32) -> (i32, i32, i32) {
    %c0_i32 = arith.constant 0 : i32
    %c0_i32_0 = arith.constant 0 : i32
    %c0_i32_1 = arith.constant 0 : i32
    %c0_i32_2 = arith.constant 0 : i32
    return %c0_i32, %c0_i32_0, %c0_i32_1 : i32, i32, i32
  }
  func.func @transform_2(%arg0: i32) -> (i32, i32, i32) {
    %c0_i32 = arith.constant 0 : i32
    %c0_i32_0 = arith.constant 0 : i32
    %c0_i32_1 = arith.constant 0 : i32
    %c0_i32_2 = arith.constant 0 : i32
    return %c0_i32, %c0_i32_0, %c0_i32_1 : i32, i32, i32
  }
  func.func @transform_3(%arg0: i32) -> (i32, i32) {
    %c0_i32 = arith.constant 0 : i32
    %c0_i32_0 = arith.constant 0 : i32
    %c0_i32_1 = arith.constant 0 : i32
    return %c0_i32, %c0_i32_0 : i32, i32
  }
  func.func @transform_4(%arg0: i32) -> (i32, i32, i32) {
    %c0_i32 = arith.constant 0 : i32
    %c0_i32_0 = arith.constant 0 : i32
    %c0_i32_1 = arith.constant 0 : i32
    %c0_i32_2 = arith.constant 0 : i32
    return %c0_i32, %c0_i32_0, %c0_i32_1 : i32, i32, i32
  }
  func.func @transform_5(%arg0: i32) -> (i32, i32, i32) {
    %c0_i32 = arith.constant 0 : i32
    %c0_i32_0 = arith.constant 0 : i32
    %c0_i32_1 = arith.constant 0 : i32
    %c0_i32_2 = arith.constant 0 : i32
    return %c0_i32, %c0_i32_0, %c0_i32_1 : i32, i32, i32
  }
  func.func @transform_6(%arg0: i32) -> (i32, i32) {
    %c0_i32 = arith.constant 0 : i32
    %c0_i32_0 = arith.constant 0 : i32
    %c0_i32_1 = arith.constant 0 : i32
    return %c0_i32, %c0_i32_0 : i32, i32
  }
  func.func @transform_7(%arg0: i32) -> (i32, i32, i32) {
    %c0_i32 = arith.constant 0 : i32
    %c0_i32_0 = arith.constant 0 : i32
    %c0_i32_1 = arith.constant 0 : i32
    %c0_i32_2 = arith.constant 0 : i32
    return %c0_i32, %c0_i32_0, %c0_i32_1 : i32, i32, i32
  }
  func.func @transform_8(%arg0: i32) -> (i32, i32, i32) {
    %c0_i32 = arith.constant 0 : i32
    %c0_i32_0 = arith.constant 0 : i32
    %c0_i32_1 = arith.constant 0 : i32
    %c0_i32_2 = arith.constant 0 : i32
    return %c0_i32, %c0_i32_0, %c0_i32_1 : i32, i32, i32
  }
  func.func @transform_9(%arg0: i32) -> (i32, i32) {
    %c0_i32 = arith.constant 0 : i32
    %c0_i32_0 = arith.constant 0 : i32
    %c0_i32_1 = arith.constant 0 : i32
    return %c0_i32, %c0_i32_0 : i32, i32
  }
  func.func @transform_10(%arg0: i32) -> (i32, i32, i32) {
    %c0_i32 = arith.constant 0 : i32
    %c0_i32_0 = arith.constant 0 : i32
    %c0_i32_1 = arith.constant 0 : i32
    %c0_i32_2 = arith.constant 0 : i32
    return %c0_i32, %c0_i32_0, %c0_i32_1 : i32, i32, i32
  }
  func.func @transform_11(%arg0: i32) -> (i32, i32, i32) {
    %c0_i32 = arith.constant 0 : i32
    %c0_i32_0 = arith.constant 0 : i32
    %c0_i32_1 = arith.constant 0 : i32
    %c0_i32_2 = arith.constant 0 : i32
    return %c0_i32, %c0_i32_0, %c0_i32_1 : i32, i32, i32
  }
  func.func @transform_12(%arg0: i32) -> (i32, i32) {
    %c0_i32 = arith.constant 0 : i32
    %c0_i32_0 = arith.constant 0 : i32
    %c0_i32_1 = arith.constant 0 : i32
    return %c0_i32, %c0_i32_0 : i32, i32
  }
  func.func @transform_13(%arg0: i32) -> (i32, i32, i32) {
    %c0_i32 = arith.constant 0 : i32
    %c0_i32_0 = arith.constant 0 : i32
    %c0_i32_1 = arith.constant 0 : i32
    %c0_i32_2 = arith.constant 0 : i32
    return %c0_i32, %c0_i32_0, %c0_i32_1 : i32, i32, i32
  }
  func.func @transform_14(%arg0: i32) -> (i32, i32, i32) {
    %c0_i32 = arith.constant 0 : i32
    %c0_i32_0 = arith.constant 0 : i32
    %c0_i32_1 = arith.constant 0 : i32
    %c0_i32_2 = arith.constant 0 : i32
    return %c0_i32, %c0_i32_0, %c0_i32_1 : i32, i32, i32
  }
  func.func @transform_15(%arg0: i32) -> (i32, i32) {
    %c0_i32 = arith.constant 0 : i32
    %c0_i32_0 = arith.constant 0 : i32
    %c0_i32_1 = arith.constant 0 : i32
    return %c0_i32, %c0_i32_0 : i32, i32
  }
  func.func @transform_16(%arg0: i32) -> (i32, i32, i32) {
    %c0_i32 = arith.constant 0 : i32
    %c0_i32_0 = arith.constant 0 : i32
    %c0_i32_1 = arith.constant 0 : i32
    %c0_i32_2 = arith.constant 0 : i32
    return %c0_i32, %c0_i32_0, %c0_i32_1 : i32, i32, i32
  }
  func.func @transform_17(%arg0: i32) -> (i32, i32, i32) {
    %c0_i32 = arith.constant 0 : i32
    %c0_i32_0 = arith.constant 0 : i32
    %c0_i32_1 = arith.constant 0 : i32
    %c0_i32_2 = arith.constant 0 : i32
    return %c0_i32, %c0_i32_0, %c0_i32_1 : i32, i32, i32
  }
  func.func @transform_18(%arg0: i32) -> (i32, i32) {
    %c0_i32 = arith.constant 0 : i32
    %c0_i32_0 = arith.constant 0 : i32
    %c0_i32_1 = arith.constant 0 : i32
    return %c0_i32, %c0_i32_0 : i32, i32
  }
  func.func @transform_19(%arg0: i32) -> (i32, i32, i32) {
    %c0_i32 = arith.constant 0 : i32
    %c0_i32_0 = arith.constant 0 : i32
    %c0_i32_1 = arith.constant 0 : i32
    %c0_i32_2 = arith.constant 0 : i32
    return %c0_i32, %c0_i32_0, %c0_i32_1 : i32, i32, i32
  }
  func.func @transform_20(%arg0: i32) -> (i32, i32) {
    %c0_i32 = arith.constant 0 : i32
    %c0_i32_0 = arith.constant 0 : i32
    %c0_i32_1 = arith.constant 0 : i32
    return %c0_i32, %c0_i32_0 : i32, i32
  }
  func.func @transform_21(%arg0: i32) -> (i32, i32, i32) {
    %c0_i32 = arith.constant 0 : i32
    %c0_i32_0 = arith.constant 0 : i32
    %c0_i32_1 = arith.constant 0 : i32
    return %arg0, %c0_i32, %c0_i32_0 : i32, i32, i32
  }
}

</mosaic_0001>

<bundles_post_ra>
// kernel: tpu_custom_call.1
= control target key start
LH: loop header
LB: loop body
LE: loop exit
PB: predicated region body
PF: predicated region fallthrough
CT: control target
= control target key end

     0   :  { %s5494_s0 = inlined_call_operand.vmem [shape: f32[4,16,25], index: 0, kind: input, shape index: {}]   ;;  %s5495_s1 = inlined_call_operand.vmem [shape: f32[3,16,16], index: 1, kind: input, shape index: {}]   ;;  %s5496_s2 = inlined_call_operand.vmem [shape: f32[3,25,180], index: 2, kind: input, shape index: {}]   ;;  %s5497_s3 = inlined_call_operand.vmem [shape: f32[1,180], index: 3, kind: input, shape index: {}]   ;;  %s5498_s4 = inlined_call_operand.vmem [shape: f32[3,8,16], index: 4, kind: input, shape index: {}]   ;;  %s5499_s5 = inlined_call_operand.vmem [shape: f32[3,180,8], index: 5, kind: input, shape index: {}]   ;;  %s5500_s6 = inlined_call_operand.vmem [shape: f32[1,8], index: 6, kind: input, shape index: {}]   ;;  %s5501_s7 = inlined_call_operand.vmem [shape: f32[3,6,8], index: 7, kind: input, shape index: {}]   ;;  %s5502_s8 = inlined_call_operand.vmem [shape: f32[3,8,140], index: 8, kind: input, shape index: {}]   ;;  %s5503_s9 = inlined_call_operand.vmem [shape: f32[1,140], index: 9, kind: input, shape index: {}]   ;;  %s5504_s10 = inlined_call_operand.vmem [shape: f32[2,3,6], index: 10, kind: input, shape index: {}]   ;;  %s5505_s11 = inlined_call_operand.vmem [shape: f32[2,140,2], index: 11, kind: input, shape index: {}]   ;;  %s5506_s12 = inlined_call_operand.vmem [shape: f32[1,2], index: 12, kind: input, shape index: {}]   ;;  %s5507_s13 = inlined_call_operand.vmem [shape: f32[3,3,3], index: 13, kind: input, shape index: {}]   ;;  %s5508_s14 = inlined_call_operand.vmem [shape: f32[3,2,35], index: 14, kind: input, shape index: {}]   ;;  %s5509_s15 = inlined_call_operand.vmem [shape: f32[1,35], index: 15, kind: input, shape index: {}]   ;;  %s5510_s16 = inlined_call_operand.vmem [shape: f32[3,2,3], index: 16, kind: input, shape index: {}]   ;;  %s5511_s17 = inlined_call_operand.vmem [shape: f32[3,35,4], index: 17, kind: input, shape index: {}]   ;;  %s5512_s18 = inlined_call_operand.vmem [shape: f32[1,4], index: 18, kind: input, shape index: {}]   ;;  %s5513_s19 = inlined_call_operand.vmem [shape: f32[2,4,10], index: 19, kind: input, shape index: {}]   ;;  %s5514_s20 = inlined_call_operand.vmem [shape: f32[1,10], index: 20, kind: input, shape index: {}]   ;;  %s5515_s21 = inlined_call_operand.hbm [shape: f32[4,1,10], index: 21, kind: output, shape index: {}]  }
   0x1   :  { %5530 = sst [smem:[#allocation12_spill]] %s5494_s0 }
   0x2   :  { %5531 = sst [smem:[#allocation13_spill]] %s5495_s1 }
   0x3   :  { %5532 = sst [smem:[#allocation14_spill]] %s5496_s2 }
   0x4   :  { %5533 = sst [smem:[#allocation15_spill]] %s5497_s3 }
   0x5   :  { %5534 = sst [smem:[#allocation16_spill]] %s5498_s4 }
   0x6   :  { %5535 = sst [smem:[#allocation17_spill]] %s5499_s5 }
   0x7   :  { %5536 = sst [smem:[#allocation18_spill]] %s5500_s6 }
   0x8   :  { %5537 = sst [smem:[#allocation19_spill]] %s5514_s20 }
   0x9   :  { %5538 = sst [smem:[#allocation20_spill]] %s5515_s21 }
   0xa   :  { %26 = vsyncpa [#allocation3], 0 }
   0xb   :  { %28 = vsyncpa [#allocation3 + $0x1], 0  ;;  %s4629_s2 = smov 0   ;;  %s4631_s25 = smov 0  }
   0xc   :  { %s4633_s26 = smov 0   ;;  %s4635_s27 = smov 0  }
   0xd LB: > { %5539 = sst [smem:[#allocation5_spill]] %s4500_s2  ;;  %s4650_s3 = sadd.s32 4294967295, %s4512_s27   ;;  %s4512_s27 = sphi %s4635_s27, %s5563_s27   ;;  %s4508_s26 = sphi %s4633_s26, %s5568_s26   ;;  %s4504_s25 = sphi %s4631_s25, %s5567_s25   ;;  %s4500_s2 = sphi %s4629_s2, %s5566_s2  }
   0xe   : > { %5540 = sst [smem:[#allocation6_spill]] %s4508_s26  ;;  %s3782_s28 = sadd.s32 4294967294, %s4512_s27  }
   0xf   : > { %5541 = sst [smem:[#allocation7_spill]] %s4512_s27  ;;  %s4654_s29 = sadd.s32 1, %s4512_s27  }
  0x10   : > { %5542 = sst [smem:[#allocation8_spill]] %s4654_s29  ;;  %s487_s0 = sadd.s32 1, %s4508_s26 }
  0x11   : > { %s484_s4 = ssub.s32 %s4512_s27, %s4654_s29  ;;  %p497_p0 = scmp.ne.s32.totalorder %s4508_s26, %s4504_s25 }
  0x12   : > { %p485_p1 = scmp.eq.s32.totalorder %s484_s4, 0  ;;  %p498_p2 = scmp.eq.s32.totalorder %s4650_s3, 3 }
  0x13   : > { %p503_p3 = scmp.ne.s32.totalorder %s4504_s25, %s4500_s2  ;;  %p504_p4 = scmp.eq.s32.totalorder %s3782_s28, 3 }
  0x14   : > { %s4665_s30 = scalar_select %p485_p1, %s4508_s26, %s487_s0  }
  0x15   : > { %p4667_p5 = por %p498_p2, %p497_p0  ;;  %p4671_p6 = por %p504_p4, %p503_p3 }
  0x16   : > { %5543 = sst [smem:[#allocation9_spill]] %s4665_s30  ;;  %p3785_p7 = scmp.ge.s32.totalorder %s4512_s27, 1 }
  0x17   : > { %s5544_s5 = scalar_select %p4667_p5, 1, 0 }
  0x18   : > { %s5546_s22 = scalar_select %p4671_p6, 1, 0 }
  0x19   : > { %5545 = sst [smem:[#allocation10_spill]] %s5544_s5  ;;  %p590_p8 = scmp.lt.s32.totalorder %s4512_s27, 5 }
  0x1a   : > { %5547 = sst [smem:[#allocation11_spill]] %s5546_s22 }
  0x1b   : > { %p591_p9 = pnand %p3785_p7, %p590_p8 }
  0x1c   : > { %p649_p10 = scmp.lt.s32.totalorder (!%p591_p9), %s4650_s3, 3  ;;  %vm658_vm0 = vcmask (!%p591_p9), 130048   ;;  %s5548_s24 = sld [smem:[#allocation13_spill]] (!%p591_p9)  ;;  %vm848_vm1 = vcmask (!%p591_p9), 1040384   ;;  %vm4514_vm2 = vmmov (!%p591_p9), 1   ;;  %v4515_v25 = vmov (!%p591_p9), 0.0  }
  0x1d   : > { %594 = sbr.rel (%p591_p9) target bundleno = 3787 (0xecb), region = 104  ;;  %s5549_s22 = sld [smem:[#allocation14_spill]] (!%p591_p9)  ;;  %vm4726_vm3 = vmpackc.low (!%p591_p9), %vm848_vm1, %vm4514_vm2  ;;  %vm841_vm4 = vcmask (!%p591_p9), 203776   ;;  %v4516_v53 = vmov (!%p591_p9), 0.0|0.0   ;;  %vm1429_vm5 = vcmask (!%p591_p9), 1043456   ;;  %vm1425_vm6 = vcmask (!%p591_p9), 424960  }
  0x1e   : > { %s5550_s21 = sld [smem:[#allocation12_spill]] (!%p591_p9)  ;;  %s5553_s0 = sld [smem:[#allocation17_spill]] (!%p591_p9)  ;;  %vm4517_vm7 = vmmov (!%p591_p9), 0   ;;  %vm1766_vm8 = vcmask (!%p591_p9), 64512   ;;  %vm2243_vm9 = vcmask (!%p591_p9), 1045504   ;;  %vm2239_vm10 = vcmask (!%p591_p9), 48128   ;;  %vm4344_vm11 = vmpackc.low (!%p591_p9), %vm1429_vm5, %vm4514_vm2 }
  0x1f   : > { %s5554_s23 = sld [smem:[#allocation15_spill]] (!%p591_p9)  ;;  %s5555_s28 = sld [smem:[#allocation16_spill]] (!%p591_p9)  ;;  %vm2434_vm12 = vcmask (!%p591_p9), 97280   ;;  %vm2601_vm13 = vcmask (!%p591_p9), 1042432   ;;  %vm2597_vm14 = vcmask (!%p591_p9), 23552   ;;  %vm2757_vm15 = vcmask (!%p591_p9), 1041408  }
  0x20   : > { %s5556_s6 = sld [smem:[#allocation18_spill]] (!%p591_p9)  ;;  %vm3233_vm1 = vcmask (!%p591_p9), 285696   ;;  %vm3555_vm2 = vcmask (!%p591_p9), 31744   ;;  %s647_s26 = sand.u32 (!%p591_p9), 1, %s4504_s25  }
  0x21   : > { %s3973_s29 = sshll.u32 (!%p591_p9), %s4650_s3, 4  ;;  %s3715_s27 = scalar_lea.sflag (!%p591_p9), [#allocation3], %s647_s26 }
  0x22   : > { %v3790_v0 = vld [vmem:[%s5548_s24 + $0x10] sm:$0xff] (!%p591_p9)  ;;  %v656_v1 = vld [vmem:[%s5548_s24] sm:$0xff] (!%p591_p9)  ;;  %v3791_v12 = vld [vmem:[%s5548_s24 + $0x18] sm:$0xff] (!%p591_p9) }
  0x23   : > { %4046 = vmatprep.mubr.msk.f32.mxu1 (!%p591_p9), %vm658_vm0, %v3790_v0  ;;  %4039 = vmatprep.mubr.msk.f32.mxu0 (!%p591_p9), %vm658_vm0, %v656_v1  ;;  %v3795_v2 = vld [vmem:[%s5549_s22 + $0x48] sm:$0xff] (!%p591_p9)  ;;  %v3797_v3 = vld [vmem:[%s5549_s22 + $0x58] sm:$0xff] (!%p591_p9)  ;;  %v3794_v8 = vld [vmem:[%s5549_s22 + $0x40] sm:$0xff] (!%p591_p9) }
  0x24   : > { %s650_s4 = scalar_select %p649_p10, %s4650_s3, 3  ;;  %v4173_v7 = vpack.c.bf16 %v3797_v3, %v3795_v2  ;;  %v3796_v9 = vld [vmem:[%s5549_s22 + $0x50] sm:$0xff]  ;;  %v3799_v10 = vld [vmem:[%s5549_s22 + $0x68] sm:$0xff]  ;;  %v3801_v11 = vld [vmem:[%s5549_s22 + $0x78] sm:$0x1] }
  0x25   : > { %v657_v13 = vld [vmem:[%s5548_s24 + $0x8] sm:$0xff]  ;;  %v3810_v14 = vld [vmem:[%s5548_s24 + $0x20] sm:$0xff]  ;;  %v4175_v15 = vpack.c.bf16 %v3796_v9, %v3794_v8  ;;  %v4177_v16 = vpack.c.bf16 %v3801_v11, %v3799_v10  ;;  %v3800_v18 = vld [vmem:[%s5549_s22 + $0x70] sm:$0x1]  ;;  %s4518_s3 = smov [#allocation2]  }
  0x26   : > { %s3976_s30 = sshll.u32 %s650_s4, 4  ;;  %v3798_v17 = vld [vmem:[%s5549_s22 + $0x60] sm:$0xff]  ;;  %v3811_v20 = vld [vmem:[%s5548_s24 + $0x28] sm:$0xff]  ;;  %v743_v23 = vld [vmem:[%s5549_s22 + $0x18] sm:$0xff]  ;;  %s5559_s4 = sld [smem:[#allocation20_spill]] }
  0x27   : > { %s653_s20 = scalar_lea.vmem %s5550_s21, %s3976_s30  ;;  %v4180_v21 = vpack.c.bf16 %v3800_v18, %v3798_v17  ;;  %v741_v22 = vld [vmem:[%s5549_s22 + $0x8] sm:$0xff]  ;;  %v740_v26 = vld [vmem:[%s5549_s22] sm:$0xff]  ;;  %v742_v27 = vld [vmem:[%s5549_s22 + $0x10] sm:$0xff]  ;;  %s648_s30 = scalar_lea.vmem [#allocation2], %s647_s26 }
  0x28   : > { %v654_v4 = vld [vmem:[%s653_s20] sm:$0xff]  ;;  %v655_v5 = vld [vmem:[%s653_s20 + $0x8] sm:$0xff]  ;;  %v4183_v24 = vpack.c.bf16 %v743_v23, %v741_v22  ;;  %v747_v29 = vld [vmem:[%s5549_s22 + $0x38] sm:$0x1]  ;;  %v4185_v30 = vpack.c.bf16 %v742_v27, %v740_v26  ;;  %v1209_v23 = vlaneseq  ;;  %s5558_s20 = sld [smem:[#allocation19_spill]] }
  0x29   : > { %v4165_v6 = vpack.c.bf16 %v655_v5, %v654_v4  ;;  %v745_v28 = vld [vmem:[%s5549_s22 + $0x28] sm:$0xff]  ;;  %v744_v34 = vld [vmem:[%s5549_s22 + $0x20] sm:$0xff]  ;;  %v746_v35 = vld [vmem:[%s5549_s22 + $0x30] sm:$0x1] }
  0x2a   : > { %v4187_v32 = vpack.c.bf16 %v747_v29, %v745_v28  ;;  %v3815_v38 = vld [vmem:[%s5549_s22 + $0x88] sm:$0xff]  ;;  %v3817_v39 = vld [vmem:[%s5549_s22 + $0x98] sm:$0xff]  ;;  %v4190_v40 = vpack.c.bf16 %v746_v35, %v744_v34  ;;  %v3814_v42 = vld [vmem:[%s5549_s22 + $0x80] sm:$0xff] }
  0x2b   : > { %4170 = vmatprep.subr.bf16.mxu1 %v4165_v6  ;;  %4166 = vmatprep.subr.bf16.mxu0 %v4165_v6  ;;  %v4197_v41 = vpack.c.bf16 %v3817_v39, %v3815_v38  ;;  %v3816_v43 = vld [vmem:[%s5549_s22 + $0x90] sm:$0xff]  ;;  %v3819_v45 = vld [vmem:[%s5549_s22 + $0xa8] sm:$0xff]  ;;  %v3821_v46 = vld [vmem:[%s5549_s22 + $0xb8] sm:$0x1] }
  0x2c   : > { %4172 = vmatpush3.bf16.msra.mxu1 %v4165_v6  ;;  %4168 = vmatpush3.bf16.msra.mxu0 %v4165_v6  ;;  %v4199_v48 = vpack.c.bf16 %v3816_v43, %v3814_v42  ;;  %v4201_v49 = vpack.c.bf16 %v3821_v46, %v3819_v45  ;;  %v3818_v50 = vld [vmem:[%s5549_s22 + $0xa0] sm:$0xff]  ;;  %v3820_v51 = vld [vmem:[%s5549_s22 + $0xb0] sm:$0x1]  ;;  %v1303_v55 = vld [vmem:[%s5553_s0 + $0x8] sm:$0xff] }
  0x2d   : > { %4194 = vmatprep.subr.bf16.mxu1 %v4165_v6  ;;  %4174 = vmatprep.subr.bf16.mxu0 %v4173_v7  ;;  %v4204_v52 = vpack.c.bf16 %v3820_v51, %v3818_v50  ;;  %v1302_v54 = vld [vmem:[%s5553_s0] sm:$0xff]  ;;  %v1304_v56 = vld [vmem:[%s5553_s0 + $0x10] sm:$0xff]  ;;  %v1305_v58 = vld [vmem:[%s5553_s0 + $0x18] sm:$0xff] }
  0x2e   : > { %v4249_v57 = vpack.c.bf16 %v1303_v55, %v1302_v54  ;;  %v4252_v59 = vpack.c.bf16 %v1305_v58, %v1304_v56  ;;  %v1306_v60 = vld [vmem:[%s5553_s0 + $0x20] sm:$0xff]  ;;  %v1307_v61 = vld [vmem:[%s5553_s0 + $0x28] sm:$0xff]  ;;  %v1308_v63 = vld [vmem:[%s5553_s0 + $0x30] sm:$0xff] }
  0x2f   : > { %4047 = vmatmul.mubr.msk.f32.vlgmr.msra.gmra.mrb[0].mxu1 %vm658_vm0, %v3791_v12  ;;  %4040 = vmatmul.mubr.msk.f32.vlgmr.msra.gmra.mrb[0].mxu0 %vm658_vm0, %v657_v13  ;;  %v4255_v62 = vpack.c.bf16 %v1307_v61, %v1306_v60  ;;  %v1309_v0 = vld [vmem:[%s5553_s0 + $0x38] sm:$0xff]  ;;  %v1310_v2 = vld [vmem:[%s5553_s0 + $0x40] sm:$0xff]  ;;  %v1311_v3 = vld [vmem:[%s5553_s0 + $0x48] sm:$0xff] }
  0x30   : > { %4196 = vmatpush3.bf16.msra.mxu1 %v4165_v6  ;;  %4053 = vmatprep.mubr.msk.f32.mxu1 %vm658_vm0, %v3810_v14  ;;  %v4258_v1 = vpack.c.bf16 %v1309_v0, %v1308_v63  ;;  %v4261_v4 = vpack.c.bf16 %v1311_v3, %v1310_v2  ;;  %v1312_v5 = vld [vmem:[%s5553_s0 + $0x50] sm:$0xff]  ;;  %v1313_v6 = vld [vmem:[%s5553_s0 + $0x58] sm:$0xff]  ;;  %v1314_v8 = vld [vmem:[%s5553_s0 + $0x60] sm:$0xff] }
  0x31   : > { %4176 = vmatpush1.bf16.msra.mxu0 %v4175_v15  ;;  %919 = vmatprep.mubr.f32.mxu0 %v4515_v25  ;;  %v4264_v7 = vpack.c.bf16 %v1313_v6, %v1312_v5  ;;  %v1315_v9 = vld [vmem:[%s5553_s0 + $0x68] sm:$0xff]  ;;  %v1316_v11 = vld [vmem:[%s5553_s0 + $0x70] sm:$0xff]  ;;  %v1317_v12 = vld [vmem:[%s5553_s0 + $0x78] sm:$0xff] }
  0x32   : > { %4179 = vmatprep.subr.msk.bf16.mxu0 %vm4726_vm3, %v4177_v16  ;;  %v4267_v10 = vpack.c.bf16 %v1315_v9, %v1314_v8  ;;  %v4270_v13 = vpack.c.bf16 %v1317_v12, %v1316_v11  ;;  %v1318_v14 = vld [vmem:[%s5553_s0 + $0x80] sm:$0xff]  ;;  %v1319_v15 = vld [vmem:[%s5553_s0 + $0x88] sm:$0xff]  ;;  %v1320_v17 = vld [vmem:[%s5553_s0 + $0x90] sm:$0xff] }
  0x33   : > { %4054 = vmatmul.mubr.msk.f32.vlgmr.msra.gmra.mrb[2].mxu1 %vm658_vm0, %v3811_v20  ;;  %v4273_v16 = vpack.c.bf16 %v1319_v15, %v1318_v14  ;;  %v1321_v18 = vld [vmem:[%s5553_s0 + $0x98] sm:$0xff]  ;;  %v1322_v20 = vld [vmem:[%s5553_s0 + $0xa0] sm:$0xff]  ;;  %v3831_v50 = vld [vmem:[%s5553_s0 + $0xc8] sm:$0xff] }
  0x34   : > { %1295 = vmatprep.mubr.f32.mxu1 %v4515_v25  ;;  %v4276_v19 = vpack.c.bf16 %v1321_v18, %v1320_v17  ;;  %v1207_v27 = vld [vmem:[%s5554_s23] sm:$0x3]  ;;  %v3829_v46 = vld [vmem:[%s5553_s0 + $0xb8] sm:$0xff]  ;;  %v3832_v51 = vld [vmem:[%s5553_s0 + $0xd0] sm:$0xff]  ;;  %s3727_s23 = sshll.u32 %s648_s30, 4  ;;  %s5454_s23 = int_to_ptr.vmem [resolvable:$true] %s3727_s23 }
  0x35   : > { %4182 = vmatpush1.bf16.msk.msra.mxu0 %vm4726_vm3, %v4180_v21  ;;  %v1323_v21 = vld [vmem:[%s5553_s0 + $0xa8] sm:$0xff]  ;;  %v1227_v45 = vld [vmem:[%s5555_s28] sm:$0xff]  ;;  %v3833_v54 = vld [vmem:[%s5553_s0 + $0xd8] sm:$0xff]  ;;  %s4450_s21 = scalar_lea.vmem %s5454_s23, 16 }
  0x36   : > { %4184 = vmatprep.subr.bf16.mxu0 %v4183_v24  ;;  %v4279_v22 = vpack.c.bf16 %v1323_v21, %v1322_v20  ;;  %v4886_v24 = vshrl.u32 %v1209_v23, 7  ;;  %v3834_v55 = vld [vmem:[%s5553_s0 + $0xe0] sm:$0xff]  ;;  %v3836_v58 = vld [vmem:[%s5553_s0 + $0xf0] sm:$0xff]  ;;  %v3837_v60 = vld [vmem:[%s5553_s0 + $0xf8] sm:$0xff]  ;;  %p4451_p11 = scmp.ne.s32.totalorder %s5454_s23, %s4450_s21 }
  0x37   : > { %v4222_v56 = vpack.c.bf16 %v3834_v55, %v3833_v54  ;;  %v3838_v61 = vld [vmem:[%s5553_s0 + $0x100] sm:$0xff]  ;;  %v3839_v63 = vld [vmem:[%s5553_s0 + $0x108] sm:$0xff]  ;;  %v3840_v0 = vld [vmem:[%s5553_s0 + $0x110] sm:$0xff] }
  0x38   : > { %v1211_v26 = vsub.s32 0, %v4886_v24  ;;  %v1215_v28 = vsub.s32 1, %v4886_v24  ;;  %v3841_v2 = vld [vmem:[%s5553_s0 + $0x118] sm:$0xff]  ;;  %v3842_v3 = vld [vmem:[%s5553_s0 + $0x120] sm:$0xff]  ;;  %v3843_v5 = vld [vmem:[%s5553_s0 + $0x128] sm:$0xff]  ;;  %p4452_p12 = pnand %p4451_p11, %p4667_p5 }
  0x39   : > { %v3844_v6 = vld [vmem:[%s5553_s0 + $0x130] sm:$0xff]  ;;  %v3845_v8 = vld [vmem:[%s5553_s0 + $0x138] sm:$0xff]  ;;  %v3846_v9 = vld [vmem:[%s5553_s0 + $0x140] sm:$0xff] }
  0x3a   : > { %v1212_v29 = vrot.slane %v1207_v27, %v1211_v26  ;;  %v3847_v11 = vld [vmem:[%s5553_s0 + $0x148] sm:$0xff]  ;;  %v3848_v12 = vld [vmem:[%s5553_s0 + $0x150] sm:$0xff]  ;;  %v3849_v14 = vld [vmem:[%s5553_s0 + $0x158] sm:$0xff]  ;;  %p4453_p13 = pneg %p4452_p12 }
  0x3b   : > { %v3850_v15 = vld [vmem:[%s5553_s0 + $0x160] sm:$0xff]  ;;  %v3851_v17 = vld [vmem:[%s5553_s0 + $0x168] sm:$0xf]  ;;  %v1324_v18 = vld [vmem:[%s5553_s0 + $0xb0] sm:$0xf] }
  0x3c   : > { %v3858_v23 = vld [vmem:[%s5553_s0 + $0x170] sm:$0xff]  ;;  %v3875_v54 = vld [vmem:[%s5553_s0 + $0x1f8] sm:$0xff] }
  0x3d   : > { %v3904_v24 = vld [vmem:[%s5505_s11 + $0x98] sm:$0xff] }
 0x102   : > { %v4048_v31 = vpop.f32.mrb[0].mxu1  ;;  %v4041_v33 = vpop.f32.mrb[0].mxu0 }
 0x103   : > { %v823_v36 = vpop.f32.mrb[1].mxu1  ;;  %v731_v37 = vpop.f32.mrb[1].mxu0 }
 0x104   : > { %3804 = vmatmul.mubr.msk.f32.vlgmr.msra.gmra.mrb[2].mxu0 %vm841_vm4, %v823_v36 }
 0x105   : > { %4186 = vmatpush1.bf16.msra.mxu0 %v4185_v30  ;;  %925 = vmatprep.mubr.f32.mxu0 %v4515_v25 }
 0x106   : > { %4189 = vmatprep.subr.msk.bf16.mxu0 %vm4726_vm3, %v4187_v32  ;;  %v4055_v44 = vpop.f32.mrb[2].mxu1 }
 0x107   : > { %v1096_v47 = vpop.f32.mrb[3].mxu1 }
 0x108   : > { %3805 = vmatmul.mubr.msk.f32.gmra.mrb[4].mxu0 %vm841_vm4, %v4048_v31  ;;  %v1216_v31 = vrot.slane %v1207_v27, %v1215_v28  ;;  %v3859_v27 = vld [vmem:[%s5553_s0 + $0x178] sm:$0xff] }
 0x109   : > { %4192 = vmatpush1.bf16.msk.msra.mxu0 %vm4726_vm3, %v4190_v40  ;;  %1008 = vmatprep.mubr.f32.mxu0 %v4515_v25 }
 0x10a   : > { %4198 = vmatprep.subr.bf16.mxu0 %v4197_v41 }
 0x10c   : > { %3808 = vmatmul.mubr.msk.f32.vlgmr.msra.gmra.mrb[2].mxu0 %vm841_vm4, %v731_v37 }
 0x10d   : > { %4200 = vmatpush1.bf16.msra.mxu0 %v4199_v48  ;;  %1014 = vmatprep.mubr.f32.mxu0 %v4515_v25  ;;  %v3827_v48 = vld [vmem:[%s5555_s28 + $0x8] sm:$0xff] }
 0x10e   : > { %4203 = vmatprep.subr.msk.bf16.mxu0 %vm4726_vm3, %v4201_v49 }
 0x110   : > { %3809 = vmatmul.mubr.msk.f32.gmra.mrb[4].mxu0 %vm841_vm4, %v4041_v33 }
 0x111   : > { %4206 = vmatpush1.bf16.msk.msra.mxu0 %vm4726_vm3, %v4204_v52  ;;  %1190 = vmatprep.mubr.f32.mxu0 %v4515_v25  ;;  %v4219_v52 = vpack.c.bf16 %v3832_v51, %v3831_v50  ;;  %v3873_v50 = vld [vmem:[%s5553_s0 + $0x1e8] sm:$0xff]  ;;  %vm3712_vm3 = vcmask 73728  }
 0x112   : > { %4248 = vmatprep.subr.bf16.mxu0 %v4516_v53 }
 0x114   : > { %3824 = vmatmul.mubr.msk.f32.vlgmr.msra.gmra.mrb[2].mxu0 %vm841_vm4, %v1096_v47  ;;  %v3830_v47 = vld [vmem:[%s5553_s0 + $0xc0] sm:$0xff] }
 0x115   : > { %1196 = vmatprep.mubr.f32.mxu0 %v4515_v25  ;;  %4250 = vmatpush1.bf16.msra.mxu0 %v4249_v57  ;;  %v4216_v49 = vpack.c.bf16 %v3830_v47, %v3829_v46  ;;  %v3835_v57 = vld [vmem:[%s5553_s0 + $0xe8] sm:$0xff]  ;;  %v3870_v46 = vld [vmem:[%s5553_s0 + $0x1d0] sm:$0xff]  ;;  %v3871_v47 = vld [vmem:[%s5553_s0 + $0x1d8] sm:$0xff] }
 0x116   : > { %4251 = vmatprep.subr.bf16.mxu0 %v4516_v53 }
 0x118   : > { %3825 = vmatmul.mubr.msk.f32.gmra.mrb[4].mxu0 %vm841_vm4, %v4055_v44 }
 0x119   : > { %4253 = vmatpush1.bf16.msra.mxu0 %v4252_v59  ;;  %v4225_v59 = vpack.c.bf16 %v3836_v58, %v3835_v57  ;;  %v3877_v57 = vld [vmem:[%s5553_s0 + $0x208] sm:$0xff] }
 0x11a   : > { %4254 = vmatprep.subr.bf16.mxu0 %v4516_v53 }
 0x11d   : > { %4256 = vmatpush1.bf16.msra.mxu0 %v4255_v62  ;;  %v4228_v62 = vpack.c.bf16 %v3838_v61, %v3837_v60  ;;  %v3879_v60 = vld [vmem:[%s5553_s0 + $0x218] sm:$0xff] }
 0x11e   : > { %4257 = vmatprep.subr.bf16.mxu0 %v4516_v53 }
 0x121   : > { %4259 = vmatpush1.bf16.msra.mxu0 %v4258_v1  ;;  %v4231_v1 = vpack.c.bf16 %v3840_v0, %v3839_v63 }
 0x122   : > { %4260 = vmatprep.subr.bf16.mxu0 %v4516_v53 }
 0x125   : > { %4262 = vmatpush1.bf16.msra.mxu0 %v4261_v4  ;;  %v4234_v4 = vpack.c.bf16 %v3842_v3, %v3841_v2 }
 0x126   : > { %4263 = vmatprep.subr.bf16.mxu0 %v4516_v53 }
 0x129   : > { %4265 = vmatpush1.bf16.msra.mxu0 %v4264_v7  ;;  %v4237_v7 = vpack.c.bf16 %v3844_v6, %v3843_v5 }
 0x12a   : > { %4266 = vmatprep.subr.bf16.mxu0 %v4516_v53 }
 0x12d   : > { %4268 = vmatpush1.bf16.msra.mxu0 %v4267_v10  ;;  %v4240_v10 = vpack.c.bf16 %v3846_v9, %v3845_v8 }
 0x12e   : > { %4269 = vmatprep.subr.bf16.mxu0 %v4516_v53 }
 0x131   : > { %4271 = vmatpush1.bf16.msra.mxu0 %v4270_v13  ;;  %v4243_v13 = vpack.c.bf16 %v3848_v12, %v3847_v11  ;;  %v1765_v12 = vld [vmem:[%s5501_s7] sm:$0x3f] }
 0x132   : > { %4272 = vmatprep.subr.bf16.mxu0 %v4516_v53 }
 0x135   : > { %4274 = vmatpush1.bf16.msra.mxu0 %v4273_v16  ;;  %v4246_v16 = vpack.c.bf16 %v3850_v15, %v3849_v14  ;;  %v3888_v14 = vld [vmem:[%s5502_s8 + $0x18] sm:$0xff]  ;;  %v3887_v15 = vld [vmem:[%s5502_s8 + $0x10] sm:$0xff] }
 0x136   : > { %4275 = vmatprep.subr.bf16.mxu0 %v4516_v53 }
 0x139   : > { %4277 = vmatpush1.bf16.msra.mxu0 %v4276_v19 }
 0x13a   : > { %4278 = vmatprep.subr.bf16.mxu0 %v4516_v53 }
 0x13d   : > { %4280 = vmatpush1.bf16.msra.mxu0 %v4279_v22 }
 0x13e   : > { %1553 = vmatprep.subr.mxu0 %v4515_v25 }
 0x141   : > { %3854 = vmatpush1.msk.msra.mxu0 %vm1429_vm5, %v1324_v18 }
 0x142   : > { %4056 = vmatprep.subr.mxu0 %v4515_v25 }
 0x1e7   : > { %v1192_v30 = vpop.f32.mrb[2].mxu0 }
 0x1e8   : > { %v1194_v32 = vpop.f32.mrb[3].mxu0  ;;  %v1219_v33 = vadd.f32 %v1212_v29, %v1192_v30  ;;  %v4286_v30 = vpack.c.bf16 %v3859_v27, %v3858_v23  ;;  %v3891_v23 = vld [vmem:[%s5501_s7 + $0x10] sm:$0x3f]  ;;  %v3893_v27 = vld [vmem:[%s5502_s8 + $0x20] sm:$0xff] }
 0x1e9   : > { %v1220_v34 = vadd.f32 %v1216_v31, %v1194_v32  ;;  %v3861_v32 = vld [vmem:[%s5553_s0 + $0x188] sm:$0xff] }
 0x1ea   : > { %v1223_v39 = vmax.f32 %v1219_v33, 0.0 }
 0x1eb   : > { %v1198_v35 = vpop.f32.mrb[4].mxu0  ;;  %v1224_v41 = vmax.f32 %v1220_v34, 0.0  ;;  %v3862_v34 = vld [vmem:[%s5553_s0 + $0x190] sm:$0xff] }
 0x1ec   : > { %v1221_v36 = vadd.f32 %v1212_v29, %v1198_v35  ;;  %v1200_v37 = vpop.f32.mrb[5].mxu0  ;;  %v3856_v29 = vld [vmem:[%s5555_s28 + $0x10] sm:$0xff]  ;;  %v3863_v35 = vld [vmem:[%s5553_s0 + $0x198] sm:$0xff] }
 0x1ed   : > { %v1222_v38 = vadd.f32 %v1216_v31, %v1200_v37  ;;  %v3860_v31 = vld [vmem:[%s5553_s0 + $0x180] sm:$0xff] }
 0x1ee   : > { %v1225_v40 = vmax.f32 %v1221_v36, 0.0  ;;  %v4289_v33 = vpack.c.bf16 %v3861_v32, %v3860_v31  ;;  %v4292_v36 = vpack.c.bf16 %v3863_v35, %v3862_v34  ;;  %v3864_v37 = vld [vmem:[%s5553_s0 + $0x1a0] sm:$0xff]  ;;  %v2322_v32 = vld [vmem:[%s5505_s11 + $0x8] sm:$0xff]  ;;  %v2323_v34 = vld [vmem:[%s5505_s11 + $0x10] sm:$0xff] }
 0x1ef   : > { %v1226_v42 = vmax.f32 %v1222_v38, 0.0  ;;  %v3865_v38 = vld [vmem:[%s5553_s0 + $0x1a8] sm:$0xff]  ;;  %v2321_v31 = vld [vmem:[%s5505_s11] sm:$0xff]  ;;  %v2324_v35 = vld [vmem:[%s5505_s11 + $0x18] sm:$0xff] }
 0x1f0   : > { %v4897_v43 = vpack.c.bf16 %v1225_v40, %v1223_v39  ;;  %v4295_v39 = vpack.c.bf16 %v3865_v38, %v3864_v37  ;;  %v3866_v40 = vld [vmem:[%s5553_s0 + $0x1b0] sm:$0xff]  ;;  %v2325_v37 = vld [vmem:[%s5505_s11 + $0x20] sm:$0xff]  ;;  %v2326_v38 = vld [vmem:[%s5505_s11 + $0x28] sm:$0xff] }
 0x1f1   : > { %v4899_v44 = vpack.c.bf16 %v1226_v42, %v1224_v41  ;;  %v3867_v41 = vld [vmem:[%s5553_s0 + $0x1b8] sm:$0xff] }
 0x1f2   : > { %v4298_v42 = vpack.c.bf16 %v3867_v41, %v3866_v40  ;;  %v2327_v40 = vld [vmem:[%s5505_s11 + $0x30] sm:$0xff]  ;;  %v2328_v41 = vld [vmem:[%s5505_s11 + $0x38] sm:$0xff] }
 0x1f3   : > { %4208 = vmatprep.subr.bf16.mxu1 %v4899_v44 }
 0x1f4   : > { %4210 = vmatpush1.bf16.msra.mxu1 %v4897_v43 }
 0x1f5   : > { %4212 = vmatprep.subr.bf16.mxu1 %v4899_v44 }
 0x1f7   : > { %3826 = vmatmul.mubr.msk.f32.vlgmr.msra.gmra.mrb[4].mxu1 %vm658_vm0, %v1227_v45 }
 0x1f8   : > { %4214 = vmatpush1.bf16.msra.mxu1 %v4897_v43  ;;  %1394 = vmatprep.mubr.f32.mxu1 %v4515_v25 }
 0x1f9   : > { %4215 = vmatprep.subr.bf16.mxu1 %v4516_v53 }
 0x1fb   : > { %3828 = vmatmul.mubr.msk.f32.vlgmr.msra.gmra.mrb[6].mxu1 %vm658_vm0, %v3827_v48  ;;  %v4304_v48 = vpack.c.bf16 %v3871_v47, %v3870_v46  ;;  %v2331_v46 = vld [vmem:[%s5505_s11 + $0x50] sm:$0xff]  ;;  %v2332_v47 = vld [vmem:[%s5505_s11 + $0x58] sm:$0xff] }
 0x1fc   : > { %4217 = vmatpush1.bf16.msra.mxu1 %v4216_v49  ;;  %v3872_v49 = vld [vmem:[%s5553_s0 + $0x1e0] sm:$0xff] }
 0x1fd   : > { %4218 = vmatprep.subr.bf16.mxu1 %v4516_v53  ;;  %v4307_v51 = vpack.c.bf16 %v3873_v50, %v3872_v49  ;;  %v2333_v49 = vld [vmem:[%s5505_s11 + $0x60] sm:$0xff]  ;;  %v2334_v50 = vld [vmem:[%s5505_s11 + $0x68] sm:$0xff] }
 0x200   : > { %4220 = vmatpush1.bf16.msra.mxu1 %v4219_v52  ;;  %v3874_v52 = vld [vmem:[%s5553_s0 + $0x1f0] sm:$0xff] }
 0x201   : > { %4221 = vmatprep.subr.bf16.mxu1 %v4516_v53  ;;  %v4310_v55 = vpack.c.bf16 %v3875_v54, %v3874_v52  ;;  %v2335_v52 = vld [vmem:[%s5505_s11 + $0x70] sm:$0xff]  ;;  %v2336_v54 = vld [vmem:[%s5505_s11 + $0x78] sm:$0xff] }
 0x204   : > { %4223 = vmatpush1.bf16.msra.mxu1 %v4222_v56  ;;  %v3876_v56 = vld [vmem:[%s5553_s0 + $0x200] sm:$0xff] }
 0x205   : > { %4224 = vmatprep.subr.bf16.mxu1 %v4516_v53  ;;  %v4313_v58 = vpack.c.bf16 %v3877_v57, %v3876_v56  ;;  %v2222_v56 = vld [vmem:[%s5503_s9] sm:$0x3] }
 0x206   : > { %v2227_v57 = vrot.slane %v2222_v56, %v1211_v26  ;;  %v3903_v26 = vld [vmem:[%s5505_s11 + $0x90] sm:$0xff] }
 0x208   : > { %4226 = vmatpush1.bf16.msra.mxu1 %v4225_v59  ;;  %v3878_v59 = vld [vmem:[%s5553_s0 + $0x210] sm:$0xff] }
 0x209   : > { %4227 = vmatprep.subr.bf16.mxu1 %v4516_v53  ;;  %v4316_v61 = vpack.c.bf16 %v3879_v60, %v3878_v59 }
 0x20c   : > { %4229 = vmatpush1.bf16.msra.mxu1 %v4228_v62  ;;  %v3880_v62 = vld [vmem:[%s5553_s0 + $0x220] sm:$0xf] }
 0x20d   : > { %4230 = vmatprep.subr.bf16.mxu1 %v4516_v53 }
 0x210   : > { %4232 = vmatpush1.bf16.msra.mxu1 %v4231_v1 }
 0x211   : > { %4233 = vmatprep.subr.bf16.mxu1 %v4516_v53 }
 0x214   : > { %4235 = vmatpush1.bf16.msra.mxu1 %v4234_v4 }
 0x215   : > { %4236 = vmatprep.subr.bf16.mxu1 %v4516_v53 }
 0x218   : > { %4238 = vmatpush1.bf16.msra.mxu1 %v4237_v7  ;;  %v3883_v7 = vld [vmem:[%s5556_s6] ss:$0 sm:$0xff] }
 0x219   : > { %4239 = vmatprep.subr.bf16.mxu1 %v4516_v53 }
 0x21c   : > { %4241 = vmatpush1.bf16.msra.mxu1 %v4240_v10 }
 0x21d   : > { %4242 = vmatprep.subr.bf16.mxu1 %v4516_v53 }
 0x220   : > { %4244 = vmatpush1.bf16.msra.mxu1 %v4243_v13  ;;  %v3885_v13 = vld [vmem:[%s5501_s7 + $0x8] sm:$0x3f] }
 0x221   : > { %4245 = vmatprep.subr.bf16.mxu1 %v4516_v53 }
 0x224   : > { %4247 = vmatpush1.bf16.msra.mxu1 %v4246_v16  ;;  %v1841_v16 = vld [vmem:[%s5502_s8 + $0x8] sm:$0xff] }
 0x225   : > { %1477 = vmatprep.subr.mxu1 %v4515_v25 }
 0x228   : > { %3852 = vmatpush1.msk.msra.mxu1 %vm1429_vm5, %v3851_v17 }
 0x229   : > { %4282 = vmatprep.subr.bf16.mxu1 %v4899_v44  ;;  %v3869_v44 = vld [vmem:[%s5553_s0 + $0x1c8] sm:$0xff] }
 0x2ca   : > { %v1297_v19 = vpop.f32.mrb[4].mxu1 }
 0x2cb   : > { %v1299_v20 = vpop.f32.mrb[5].mxu1 }
 0x2cc   : > { %3855 = vmatprep.mubr.msk.f32.mxu0 %vm1425_vm6, %v1299_v20 }
 0x2cd   : > { %1574 = vmatmul.mubr.f32.vlgmr.msra.gmra.mrb[6].mxu0 %v1297_v19  ;;  %v1840_v19 = vld [vmem:[%s5502_s8] sm:$0xff] }
 0x2ce   : > { %v1396_v21 = vpop.f32.mrb[6].mxu1  ;;  %4058 = vmatprep.mubr.msk.f32.mxu0 %vm4517_vm7, %v4515_v25 }
 0x2cf   : > { %v1398_v22 = vpop.f32.mrb[7].mxu1 }
 0x2d0   : > { %3853 = vmatprep.mubr.msk.f32.mxu1 %vm1425_vm6, %v1398_v22  ;;  %v3894_v22 = vld [vmem:[%s5502_s8 + $0x28] sm:$0xff] }
 0x2d1   : > { %1498 = vmatmul.mubr.f32.vlgmr.msra.gmra.mrb[8].mxu1 %v1396_v21 }
 0x2d2   : > { %4284 = vmatpush1.bf16.msra.mxu1 %v4897_v43  ;;  %1648 = vmatprep.mubr.f32.mxu1 %v4515_v25  ;;  %v3868_v43 = vld [vmem:[%s5553_s0 + $0x1c0] sm:$0xff]  ;;  %s5452_s0 = scalar_lea.hbm %s5559_s4, %s3973_s29 }
 0x2d3   : > { %4285 = vmatprep.subr.bf16.mxu1 %v4516_v53  ;;  %v4301_v45 = vpack.c.bf16 %v3869_v44, %v3868_v43  ;;  %v2329_v43 = vld [vmem:[%s5505_s11 + $0x40] sm:$0xff]  ;;  %v2330_v44 = vld [vmem:[%s5505_s11 + $0x48] sm:$0xff] }
 0x2d5   : > { %3857 = vmatmul.mubr.msk.f32.vlgmr.msra.gmra.mrb[10].mxu1 %vm658_vm0, %v3856_v29  ;;  %vm2753_vm0 = vcmask 15360  }
 0x2d6   : > { %4287 = vmatpush1.bf16.msra.mxu1 %v4286_v30 }
 0x2d7   : > { %4288 = vmatprep.subr.bf16.mxu1 %v4516_v53 }
 0x2da   : > { %4290 = vmatpush1.bf16.msra.mxu1 %v4289_v33  ;;  %v4347_v33 = vpack.c.bf16 %v2322_v32, %v2321_v31  ;;  %v3919_v31 = vld [vmem:[%s5505_s11 + $0x110] sm:$0xff]  ;;  %v3920_v32 = vld [vmem:[%s5505_s11 + $0x118] sm:$0xf] }
 0x2db   : > { %4291 = vmatprep.subr.bf16.mxu1 %v4516_v53 }
 0x2de   : > { %4293 = vmatpush1.bf16.msra.mxu1 %v4292_v36  ;;  %v4350_v36 = vpack.c.bf16 %v2324_v35, %v2323_v34 }
 0x2df   : > { %4294 = vmatprep.subr.bf16.mxu1 %v4516_v53 }
 0x2e2   : > { %4296 = vmatpush1.bf16.msra.mxu1 %v4295_v39  ;;  %v4353_v39 = vpack.c.bf16 %v2326_v38, %v2325_v37 }
 0x2e3   : > { %4297 = vmatprep.subr.bf16.mxu1 %v4516_v53 }
 0x2e6   : > { %4299 = vmatpush1.bf16.msra.mxu1 %v4298_v42  ;;  %v4356_v42 = vpack.c.bf16 %v2328_v41, %v2327_v40  ;;  %v3925_v41 = vld [vmem:[%s5506_s12] ss:$0 sm:$0xff] }
 0x2e7   : > { %4300 = vmatprep.subr.bf16.mxu1 %v4516_v53 }
 0x2ea   : > { %4302 = vmatpush1.bf16.msra.mxu1 %v4301_v45  ;;  %v4359_v45 = vpack.c.bf16 %v2330_v44, %v2329_v43 }
 0x2eb   : > { %4303 = vmatprep.subr.bf16.mxu1 %v4516_v53 }
 0x2ee   : > { %4305 = vmatpush1.bf16.msra.mxu1 %v4304_v48  ;;  %v4362_v48 = vpack.c.bf16 %v2332_v47, %v2331_v46  ;;  %v2596_v46 = vld [vmem:[%s5507_s13] sm:$0x7]  ;;  %v3928_v47 = vld [vmem:[%s5507_s13 + $0x4] sm:$0x7] }
 0x2ef   : > { %4306 = vmatprep.subr.bf16.mxu1 %v4516_v53 }
 0x2f2   : > { %4308 = vmatpush1.bf16.msra.mxu1 %v4307_v51  ;;  %v4365_v51 = vpack.c.bf16 %v2334_v50, %v2333_v49  ;;  %v3931_v49 = vld [vmem:[%s5508_s14 + $0x2] sm:$0x3] }
 0x2f3   : > { %4309 = vmatprep.subr.bf16.mxu1 %v4516_v53 }
 0x2f6   : > { %4311 = vmatpush1.bf16.msra.mxu1 %v4310_v55  ;;  %v4368_v55 = vpack.c.bf16 %v2336_v54, %v2335_v52 }
 0x2f7   : > { %4312 = vmatprep.subr.bf16.mxu1 %v4516_v53 }
 0x2fa   : > { %4314 = vmatpush1.bf16.msra.mxu1 %v4313_v58  ;;  %v2231_v58 = vrot.slane %v2222_v56, %v1215_v28  ;;  %v3899_v28 = vld [vmem:[%s5504_s10 + $0x4] sm:$0x7] }
 0x2fb   : > { %4315 = vmatprep.subr.bf16.mxu1 %v4516_v53  ;;  %v3939_v56 = vld [vmem:[%s5508_s14 + $0x4] sm:$0x3] }
 0x2fe   : > { %4317 = vmatpush1.bf16.msra.mxu1 %v4316_v61 }
 0x2ff   : > { %1729 = vmatprep.subr.mxu1 %v4515_v25 }
 0x302   : > { %3881 = vmatpush1.msk.msra.mxu1 %vm1429_vm5, %v3880_v62 }
 0x303   : > { %4346 = vmatprep.subr.bf16.mxu1 %v4516_v53 }
 0x3a0   : > { %v1575_v63 = vpop.f32.mrb[6].mxu0 }
 0x3a1   : > { %v1577_v0 = vpop.f32.mrb[7].mxu0 }
 0x3a4   : > { %v1499_v1 = vpop.f32.mrb[8].mxu1 }
 0x3a5   : > { %v1576_v2 = vadd.f32 %v1575_v63, %v1499_v1  ;;  %v1501_v3 = vpop.f32.mrb[9].mxu1  ;;  %v2238_v1 = vld [vmem:[%s5504_s10] sm:$0x7] }
 0x3a6   : > { %v3905_v3 = vld [vmem:[%s5505_s11 + $0xa0] sm:$0xff] }
 0x3a8   : > { %v1650_v4 = vpop.f32.mrb[10].mxu1 }
 0x3a9   : > { %v1652_v5 = vpop.f32.mrb[11].mxu1 }
 0x3aa   : > { %3882 = vmatprep.mubr.msk.f32.mxu1 %vm1425_vm6, %v1652_v5 }
 0x3ab   : > { %1750 = vmatmul.mubr.f32.vlgmr.msra.gmra.mrb[12].mxu1 %v1650_v4  ;;  %v3906_v4 = vld [vmem:[%s5505_s11 + $0xa8] sm:$0xff] }
 0x3ac   : > { %4348 = vmatpush1.bf16.msra.mxu1 %v4347_v33  ;;  %v4322_v5 = vpack.c.bf16 %v3906_v4, %v3905_v3  ;;  %v4343_v33 = vpack.c.bf16 %v3920_v32, %v3919_v31  ;;  %v3949_v3 = vld [vmem:[%s5511_s17 + $0x30] sm:$0xff]  ;;  %v3147_v4 = vld [vmem:[%s5511_s17] sm:$0xff] }
 0x3ad   : > { %4349 = vmatprep.subr.bf16.mxu1 %v4516_v53  ;;  %v3957_v32 = vld [vmem:[%s5510_s16 + $0x4] sm:$0x3] }
 0x3b0   : > { %4351 = vmatpush1.bf16.msra.mxu1 %v4350_v36 }
 0x3b1   : > { %4352 = vmatprep.subr.bf16.mxu1 %v4516_v53 }
 0x3b4   : > { %4354 = vmatpush1.bf16.msra.mxu1 %v4353_v39 }
 0x3b5   : > { %4355 = vmatprep.subr.bf16.mxu1 %v4516_v53 }
 0x3b8   : > { %4357 = vmatpush1.bf16.msra.mxu1 %v4356_v42 }
 0x3b9   : > { %4358 = vmatprep.subr.bf16.mxu1 %v4516_v53 }
 0x3bc   : > { %4360 = vmatpush1.bf16.msra.mxu1 %v4359_v45 }
 0x3bd   : > { %4361 = vmatprep.subr.bf16.mxu1 %v4516_v53 }
 0x3c0   : > { %4363 = vmatpush1.bf16.msra.mxu1 %v4362_v48  ;;  %v2675_v48 = vld [vmem:[%s5508_s14] sm:$0x3] }
 0x3c1   : > { %4364 = vmatprep.subr.bf16.mxu1 %v4516_v53 }
 0x3c4   : > { %4366 = vmatpush1.bf16.msra.mxu1 %v4365_v51 }
 0x3c5   : > { %4367 = vmatprep.subr.bf16.mxu1 %v4516_v53 }
 0x3c8   : > { %4369 = vmatpush1.bf16.msra.mxu1 %v4368_v55  ;;  %v3936_v55 = vld [vmem:[%s5507_s13 + $0x8] sm:$0x7] }
 0x3c9   : > { %4370 = vmatprep.subr.bf16.mxu1 %v4516_v53 }
 0x47e   : > { %v1751_v6 = vpop.f32.mrb[12].mxu1 }
 0x47f   : > { %v1755_v8 = vadd.f32 %v1751_v6, %v1576_v2  ;;  %v1753_v9 = vpop.f32.mrb[13].mxu1  ;;  %v4319_v2 = vpack.c.bf16 %v3904_v24, %v3903_v26  ;;  %v3907_v6 = vld [vmem:[%s5505_s11 + $0xb0] sm:$0xff] }
 0x480   : > { %v3909_v9 = vld [vmem:[%s5505_s11 + $0xc0] sm:$0xff] }
 0x481   : > { %v1763_v10 = vadd.f32 %v3883_v7, %v1755_v8  ;;  %v3908_v7 = vld [vmem:[%s5505_s11 + $0xb8] sm:$0xff] }
 0x482   : > { %v4325_v8 = vpack.c.bf16 %v3908_v7, %v3907_v6  ;;  %v3945_v7 = vld [vmem:[%s5510_s16 + $0x2] sm:$0x3] }
 0x483   : > { %v1764_v11 = vmax.f32 %v1763_v10, 0.0  ;;  %v3910_v10 = vld [vmem:[%s5505_s11 + $0xc8] sm:$0xff] }
 0x485   : > { %4057 = vmatpush3.msra.mxu0 %v1764_v11 }
 0x486   : > { %4059 = vmatmul.mubr.msk.f32.vlgmr.msra.gmra.mrb[8].mxu0 %vm1766_vm8, %v1765_v12  ;;  %4061 = vmatprep.subr.mxu0 %v4515_v25  ;;  %v3911_v12 = vld [vmem:[%s5505_s11 + $0xd0] sm:$0xff] }
 0x487   : > { %4062 = vmatpush3.msra.mxu0 %v1764_v11  ;;  %4063 = vmatprep.mubr.msk.f32.mxu0 %vm4517_vm7, %v4515_v25 }
 0x488   : > { %1923 = vmatprep.subr.mxu0 %v3888_v14 }
 0x48a   : > { %4064 = vmatmul.mubr.msk.f32.vlgmr.msra.gmra.mrb[10].mxu0 %vm1766_vm8, %v3885_v13  ;;  %v3912_v13 = vld [vmem:[%s5505_s11 + $0xd8] sm:$0xff] }
 0x48b   : > { %1987 = vmatprep.mubr.f32.mxu0 %v4515_v25  ;;  %1924 = vmatpush1.msra.mxu0 %v3887_v15  ;;  %v4331_v14 = vpack.c.bf16 %v3912_v13, %v3911_v12  ;;  %v3913_v15 = vld [vmem:[%s5505_s11 + $0xe0] sm:$0xff]  ;;  %v3149_v13 = vld [vmem:[%s5511_s17 + $0x10] sm:$0xff] }
 0x48c   : > { %1997 = vmatprep.subr.mxu0 %v1841_v16  ;;  %v3914_v16 = vld [vmem:[%s5505_s11 + $0xe8] sm:$0xff]  ;;  %v3951_v12 = vld [vmem:[%s5511_s17 + $0x40] sm:$0xff] }
 0x559   : > { %v1836_v17 = vpop.f32.mrb[8].mxu0 }
 0x55a   : > { %v4060_v18 = vpop.f32.mrb[9].mxu0 }
 0x55b   : > { %v3915_v18 = vld [vmem:[%s5505_s11 + $0xf0] sm:$0xff] }
 0x55d   : > { %v1913_v20 = vpop.f32.mrb[10].mxu0 }
 0x55e   : > { %v4065_v21 = vpop.f32.mrb[11].mxu0  ;;  %3889 = vmatmul.mubr.msk.f32.vlgmr.msra.gmra.mrb[12].mxu0 %vm1766_vm8, %v1913_v20 }
 0x55f   : > { %1998 = vmatpush1.msra.mxu0 %v1840_v19  ;;  %2061 = vmatprep.mubr.f32.mxu0 %v4515_v25  ;;  %v3916_v19 = vld [vmem:[%s5505_s11 + $0xf8] sm:$0xff]  ;;  %v3917_v21 = vld [vmem:[%s5505_s11 + $0x100] sm:$0xff] }
 0x560   : > { %4066 = vmatprep.subr.mxu0 %v4515_v25  ;;  %v4337_v20 = vpack.c.bf16 %v3916_v19, %v3915_v18  ;;  %v3151_v18 = vld [vmem:[%s5511_s17 + $0x20] sm:$0x7]  ;;  %v3960_v19 = vld [vmem:[%s5511_s17 + $0x50] sm:$0xff] }
 0x566   : > { %3890 = vmatmul.mubr.msk.f32.vlgmr.msra.gmra.mrb[12].mxu0 %vm1766_vm8, %v1836_v17  ;;  %v4334_v17 = vpack.c.bf16 %v3914_v16, %v3913_v15 }
 0x567   : > { %4067 = vmatpush3.msra.mxu0 %v1764_v11  ;;  %4068 = vmatprep.mubr.msk.f32.mxu0 %vm4517_vm7, %v4515_v25  ;;  %v4328_v11 = vpack.c.bf16 %v3910_v10, %v3909_v9  ;;  %v3950_v10 = vld [vmem:[%s5511_s17 + $0x38] sm:$0xff] }
 0x568   : > { %2149 = vmatprep.subr.mxu0 %v3894_v22  ;;  %v3918_v22 = vld [vmem:[%s5505_s11 + $0x108] sm:$0xff]  ;;  %v4378_v15 = vpack.c.bf16 %v3951_v12, %v3950_v10 }
 0x56a   : > { %4069 = vmatmul.mubr.msk.f32.vlgmr.msra.gmra.mrb[14].mxu0 %vm1766_vm8, %v3891_v23  ;;  %v2337_v23 = vld [vmem:[%s5505_s11 + $0x80] sm:$0xff] }
 0x56b   : > { %2213 = vmatprep.mubr.f32.mxu0 %v4515_v25  ;;  %2150 = vmatpush1.msra.mxu0 %v3893_v27  ;;  %v4340_v27 = vpack.c.bf16 %v3918_v22, %v3917_v21 }
 0x63d   : > { %v2139_v29 = vpop.f32.mrb[14].mxu0 }
 0x63e   : > { %v4070_v30 = vpop.f32.mrb[15].mxu0  ;;  %3895 = vmatmul.mubr.msk.f32.vlgmr.msra.gmra.mrb[12].mxu0 %vm1766_vm8, %v2139_v29  ;;  %v2338_v29 = vld [vmem:[%s5505_s11 + $0x88] sm:$0xf] }
 0x63f   : > { %2314 = vmatprep.mubr.f32.mxu0 %v4515_v25  ;;  %v4371_v30 = vpack.c.bf16 %v2338_v29, %v2337_v23  ;;  %v3963_v29 = vld [vmem:[%s5511_s17 + $0x68] sm:$0xff] }
 0x641   : > { %4373 = vmatpush1.bf16.msk.msra.mxu1 %vm4344_vm11, %v4371_v30 }
 0x642   : > { %4081 = vmatprep.subr.mxu1 %v4515_v25 }
 0x711   : > { %v2215_v59 = vpop.f32.mrb[12].mxu0 }
 0x712   : > { %v2234_v60 = vadd.f32 %v2227_v57, %v2215_v59  ;;  %v2217_v61 = vpop.f32.mrb[13].mxu0 }
 0x713   : > { %v2235_v62 = vadd.f32 %v2231_v58, %v2217_v61 }
 0x714   : > { %v2236_v0 = vmax.f32 %v2234_v60, 0.0 }
 0x715   : > { %v2237_v63 = vmax.f32 %v2235_v62, 0.0 }
 0x717   : > { %3896 = vmatprep.subr.msk.mxu0 %vm2243_vm9, %v2237_v63 }
 0x718   : > { %3897 = vmatpush1.msk.msra.mxu0 %vm2243_vm9, %v2236_v0 }
 0x719   : > { %3898 = vmatmul.mubr.msk.f32.vlgmr.msra.gmra.mrb[16].mxu0 %vm2239_vm10, %v2238_v1  ;;  %3900 = vmatprep.subr.msk.mxu0 %vm2243_vm9, %v2237_v63  ;;  %v3942_v1 = vld [vmem:[%s5509_s15] ss:$0 sm:$0xff] }
 0x71a   : > { %3901 = vmatpush1.msk.msra.mxu0 %vm2243_vm9, %v2236_v0  ;;  %2408 = vmatprep.mubr.f32.mxu0 %v4515_v25 }
 0x71b   : > { %4318 = vmatprep.subr.bf16.mxu0 %v4516_v53 }
 0x71d   : > { %3902 = vmatmul.mubr.msk.f32.vlgmr.msra.gmra.mrb[18].mxu0 %vm2239_vm10, %v3899_v28  ;;  %v3948_v28 = vld [vmem:[%s5511_s17 + $0x28] sm:$0xff] }
 0x71e   : > { %4320 = vmatpush1.bf16.msra.mxu0 %v4319_v2  ;;  %v4375_v9 = vpack.c.bf16 %v3949_v3, %v3948_v28 }
 0x71f   : > { %4321 = vmatprep.subr.bf16.mxu0 %v4516_v53 }
 0x722   : > { %4323 = vmatpush1.bf16.msra.mxu0 %v4322_v5  ;;  %v3148_v5 = vld [vmem:[%s5511_s17 + $0x8] sm:$0xff] }
 0x723   : > { %4324 = vmatprep.subr.bf16.mxu0 %v4516_v53 }
 0x726   : > { %4326 = vmatpush1.bf16.msra.mxu0 %v4325_v8  ;;  %v3070_v8 = vld [vmem:[%s5510_s16] sm:$0x3] }
 0x727   : > { %4327 = vmatprep.subr.bf16.mxu0 %v4516_v53 }
 0x72a   : > { %4329 = vmatpush1.bf16.msra.mxu0 %v4328_v11  ;;  %v4381_v11 = vpack.c.bf16 %v3148_v5, %v3147_v4 }
 0x72b   : > { %4330 = vmatprep.subr.bf16.mxu0 %v4516_v53 }
 0x72e   : > { %4332 = vmatpush1.bf16.msra.mxu0 %v4331_v14  ;;  %v3150_v14 = vld [vmem:[%s5511_s17 + $0x18] sm:$0xff] }
 0x72f   : > { %4333 = vmatprep.subr.bf16.mxu0 %v4516_v53  ;;  %v4384_v16 = vpack.c.bf16 %v3150_v14, %v3149_v13 }
 0x732   : > { %4335 = vmatpush1.bf16.msra.mxu0 %v4334_v17  ;;  %v3952_v17 = vld [vmem:[%s5511_s17 + $0x48] sm:$0x7] }
 0x733   : > { %4336 = vmatprep.subr.bf16.mxu0 %v4516_v53 }
 0x736   : > { %4338 = vmatpush1.bf16.msra.mxu0 %v4337_v20  ;;  %v3961_v20 = vld [vmem:[%s5511_s17 + $0x58] sm:$0xff] }
 0x737   : > { %4339 = vmatprep.subr.bf16.mxu0 %v4516_v53  ;;  %v4387_v21 = vpack.c.bf16 %v3961_v20, %v3960_v19 }
 0x73a   : > { %4341 = vmatpush1.bf16.msra.mxu0 %v4340_v27  ;;  %v3962_v27 = vld [vmem:[%s5511_s17 + $0x60] sm:$0xff] }
 0x73b   : > { %4342 = vmatprep.subr.bf16.mxu0 %v4516_v53 }
 0x73e   : > { %4345 = vmatpush1.bf16.msk.msra.mxu0 %vm4344_vm11, %v4343_v33  ;;  %v4390_v33 = vpack.c.bf16 %v3963_v29, %v3962_v27 }
 0x73f   : > { %4071 = vmatprep.subr.mxu0 %v4515_v25 }
 0x7ec   : > { %v2316_v34 = vpop.f32.mrb[16].mxu0 }
 0x7ed   : > { %v2318_v35 = vpop.f32.mrb[17].mxu0 }
 0x7ee   : > { %3924 = vmatprep.mubr.msk.f32.mxu1 %vm2434_vm12, %v2318_v35 }
 0x7ef   : > { %2582 = vmatmul.mubr.f32.vlgmr.msra.gmra.mrb[14].mxu1 %v2316_v34  ;;  %v3964_v34 = vld [vmem:[%s5511_s17 + $0x70] sm:$0x7] }
 0x7f0   : > { %v2410_v36 = vpop.f32.mrb[18].mxu0  ;;  %4083 = vmatprep.mubr.msk.f32.mxu1 %vm4517_vm7, %v4515_v25  ;;  %4082 = vmatpush3.msk.msra.mxu1 %vm2757_vm15, %v3931_v49 }
 0x7f1   : > { %v2412_v37 = vpop.f32.mrb[19].mxu0  ;;  %4091 = vmatprep.subr.mxu1 %v4515_v25 }
 0x7f2   : > { %3922 = vmatprep.mubr.msk.f32.mxu0 %vm2434_vm12, %v2412_v37 }
 0x7f3   : > { %2506 = vmatmul.mubr.f32.vlgmr.msra.gmra.mrb[20].mxu0 %v2410_v36 }
 0x7f4   : > { %4073 = vmatprep.mubr.msk.f32.mxu0 %vm4517_vm7, %v4515_v25 }
 0x8c2   : > { %v2583_v38 = vpop.f32.mrb[14].mxu1 }
 0x8c3   : > { %v2585_v39 = vpop.f32.mrb[15].mxu1 }
 0x8c6   : > { %v2507_v40 = vpop.f32.mrb[20].mxu0 }
 0x8c7   : > { %v2584_v42 = vadd.f32 %v2583_v38, %v2507_v40  ;;  %v2509_v43 = vpop.f32.mrb[21].mxu0 }
 0x8c8   : > { %v3967_v43 = vld [vmem:[%s5512_s18] ss:$0 sm:$0xff] }
 0x8c9   : > { %v2594_v44 = vadd.f32 %v3925_v41, %v2584_v42  ;;  %v3554_v41 = vld [vmem:[%s5513_s19] sm:$0xf] }
 0x8cb   : > { %v2595_v45 = vmax.f32 %v2594_v44, 0.0 }
 0x8cd   : > { %4072 = vmatpush3.msk.msra.mxu0 %vm2601_vm13, %v2595_v45 }
 0x8ce   : > { %4074 = vmatmul.mubr.msk.f32.vlgmr.msra.gmra.mrb[22].mxu0 %vm2597_vm14, %v2596_v46  ;;  %4076 = vmatprep.subr.mxu0 %v4515_v25 }
 0x8cf   : > { %4077 = vmatpush3.msk.msra.mxu0 %vm2601_vm13, %v2595_v45  ;;  %4078 = vmatprep.mubr.msk.f32.mxu0 %vm4517_vm7, %v4515_v25 }
 0x8d0   : > { %4086 = vmatprep.subr.mxu0 %v4515_v25 }
 0x8d2   : > { %4079 = vmatmul.mubr.msk.f32.vlgmr.msra.gmra.mrb[24].mxu0 %vm2597_vm14, %v3928_v47 }
 0x8d3   : > { %4088 = vmatprep.mubr.msk.f32.mxu0 %vm4517_vm7, %v4515_v25  ;;  %4087 = vmatpush3.msk.msra.mxu0 %vm2757_vm15, %v2675_v48  ;;  %v3970_v48 = vld [vmem:[%s5513_s19 + $0x4] sm:$0xf] }
 0x8d4   : > { %4096 = vmatprep.subr.mxu0 %v4515_v25 }
 0x9a1   : > { %v2671_v50 = vpop.f32.mrb[22].mxu0 }
 0x9a2   : > { %v4075_v51 = vpop.f32.mrb[23].mxu0  ;;  %4089 = vmatmul.mubr.msk.f32.vlgmr.msra.gmra.mrb[26].mxu0 %vm2753_vm0, %v2671_v50  ;;  %v3553_v50 = vld [vmem:[%s5558_s20] sm:$0x1]  ;;  %s4454_s20 = sshll.u32 %s4518_s3, 4  ;;  %s4455_s20 = int_to_ptr.vmem [resolvable:$false] %s4454_s20 }
 0x9a3   : > { %4098 = vmatprep.mubr.msk.f32.mxu0 %vm4517_vm7, %v4515_v25  ;;  %4097 = vmatpush3.msk.msra.mxu0 %vm2757_vm15, %v3939_v56  ;;  %s4456_s6 = scalar_lea.vmem %s4455_s20, 32  ;;  %p4457_p0 = scmp.lt.s32.totalorder %s5454_s23, %s4455_s20 }
 0x9a4   : > { %4106 = vmatprep.subr.mxu0 %v4515_v25  ;;  %p4458_p1 = scmp.lt.s32.totalorder %s4456_s6, %s4450_s21 }
 0x9a5   : > { %v2747_v52 = vpop.f32.mrb[24].mxu0 }
 0x9a6   : > { %v4080_v54 = vpop.f32.mrb[25].mxu0  ;;  %4084 = vmatmul.mubr.msk.f32.vlgmr.msra.gmra.mrb[16].mxu1 %vm2753_vm0, %v2747_v52  ;;  %p4459_p2 = por %p4458_p1, %p4457_p0 }
 0x9a7   : > { %4092 = vmatpush3.msk.msra.mxu1 %vm2601_vm13, %v2595_v45  ;;  %4093 = vmatprep.mubr.msk.f32.mxu1 %vm4517_vm7, %v4515_v25 }
 0x9a8   : > { %4101 = vmatprep.subr.mxu1 %v4515_v25  ;;  %p4460_p3 = pnand %p4459_p2, %p4453_p13 }
 0x9aa   : > { %4094 = vmatmul.mubr.msk.f32.vlgmr.msra.gmra.mrb[18].mxu1 %vm2597_vm14, %v3936_v55 }
 0x9ab   : > { %4103 = vmatprep.mubr.msk.f32.mxu1 %vm4517_vm7, %v4515_v25 }
 0xa75   : > { %v2903_v57 = vpop.f32.mrb[26].mxu0 }
 0xa76   : > { %v4090_v58 = vpop.f32.mrb[27].mxu0 }
 0xa79   : > { %v2827_v59 = vpop.f32.mrb[16].mxu1 }
 0xa7a   : > { %v2904_v60 = vadd.f32 %v2903_v57, %v2827_v59  ;;  %v4085_v61 = vpop.f32.mrb[17].mxu1 }
 0xa7d   : > { %v2978_v62 = vpop.f32.mrb[18].mxu1 }
 0xa7e   : > { %v4095_v63 = vpop.f32.mrb[19].mxu1  ;;  %4099 = vmatmul.mubr.msk.f32.vlgmr.msra.gmra.mrb[28].mxu0 %vm2753_vm0, %v2978_v62 }
 0xa7f   : > { %4108 = vmatprep.mubr.msk.f32.mxu0 %vm4517_vm7, %v4515_v25 }
 0xb51   : > { %v3056_v0 = vpop.f32.mrb[28].mxu0 }
 0xb52   : > { %v3060_v26 = vadd.f32 %v3056_v0, %v2904_v60  ;;  %v4100_v24 = vpop.f32.mrb[29].mxu0 }
 0xb54   : > { %v3068_v2 = vadd.f32 %v3942_v1, %v3060_v26 }
 0xb56   : > { %v3069_v6 = vmax.f32 %v3068_v2, 0.0 }
 0xb58   : > { %4102 = vmatpush3.msk.msra.mxu1 %vm2601_vm13, %v3069_v6  ;;  %4107 = vmatpush3.msk.msra.mxu0 %vm2601_vm13, %v3069_v6 }
 0xb59   : > { %4109 = vmatmul.mubr.msk.f32.vlgmr.msra.gmra.mrb[30].mxu0 %vm2597_vm14, %v3945_v7  ;;  %4104 = vmatmul.mubr.msk.f32.vlgmr.msra.gmra.mrb[20].mxu1 %vm2597_vm14, %v3070_v8 }
 0xb5a   : > { %4374 = vmatprep.subr.bf16.mxu1 %v4516_v53  ;;  %4380 = vmatprep.subr.bf16.mxu0 %v4516_v53 }
 0xb5b   : > { %4376 = vmatpush3.bf16.msra.mxu1 %v4375_v9  ;;  %4382 = vmatpush3.bf16.msra.mxu0 %v4381_v11 }
 0xb5c   : > { %4377 = vmatprep.subr.bf16.mxu1 %v4516_v53  ;;  %4383 = vmatprep.subr.bf16.mxu0 %v4516_v53 }
 0xb5d   : > { %4121 = vmatprep.mubr.msk.f32.mxu1 %vm4517_vm7, %v4515_v25  ;;  %4134 = vmatprep.mubr.msk.f32.mxu0 %vm4517_vm7, %v4515_v25 }
 0xb5f   : > { %4379 = vmatpush3.bf16.msra.mxu1 %v4378_v15  ;;  %4385 = vmatpush3.bf16.msra.mxu0 %v4384_v16 }
 0xb60   : > { %4119 = vmatprep.subr.mxu1 %v4515_v25  ;;  %4132 = vmatprep.subr.mxu0 %v4515_v25 }
 0xb63   : > { %4120 = vmatpush3.msk.msra.mxu1 %vm2601_vm13, %v3952_v17  ;;  %4133 = vmatpush3.msk.msra.mxu0 %vm2601_vm13, %v3151_v18 }
 0xb64   : > { %4137 = vmatprep.subr.mxu1 %v4515_v25  ;;  %4386 = vmatprep.subr.bf16.mxu0 %v4516_v53 }
 0xc2c   : > { %v3223_v22 = vpop.f32.mrb[30].mxu0  ;;  %v3143_v23 = vpop.f32.mrb[20].mxu1 }
 0xc2d   : > { %4122 = vmatmul.mubr.msk.f32.vlgmr.msra.gmra.mrb[22].mxu1 %vm3233_vm1, %v3223_v22  ;;  %v4110_v30 = vpop.f32.mrb[31].mxu0  ;;  %4135 = vmatmul.mubr.msk.f32.vlgmr.msra.gmra.mrb[32].mxu0 %vm3233_vm1, %v3143_v23  ;;  %v4105_v31 = vpop.f32.mrb[21].mxu1 }
 0xc2e   : > { %4138 = vmatpush3.msk.msra.mxu1 %vm2601_vm13, %v3069_v6  ;;  %4139 = vmatprep.mubr.msk.f32.mxu1 %vm4517_vm7, %v4515_v25 }
 0xc2f   : > { %4388 = vmatpush3.bf16.msra.mxu0 %v4387_v21  ;;  %4152 = vmatprep.mubr.msk.f32.mxu0 %vm4517_vm7, %v4515_v25 }
 0xc30   : > { %4389 = vmatprep.subr.bf16.mxu0 %v4516_v53  ;;  %4155 = vmatprep.subr.mxu1 %v4515_v25 }
 0xc31   : > { %4140 = vmatmul.mubr.msk.f32.vlgmr.msra.gmra.mrb[24].mxu1 %vm2597_vm14, %v3957_v32 }
 0xc32   : > { %4157 = vmatprep.mubr.msk.f32.mxu1 %vm4517_vm7, %v4515_v25  ;;  %4156 = vmatpush3.msk.msra.mxu1 %vm1429_vm5, %v3554_v41 }
 0xc33   : > { %4391 = vmatpush3.bf16.msra.mxu0 %v4390_v33  ;;  %4160 = vmatprep.subr.mxu1 %v4515_v25 }
 0xc34   : > { %4150 = vmatprep.subr.mxu0 %v4515_v25 }
 0xc37   : > { %4151 = vmatpush3.msk.msra.mxu0 %vm2601_vm13, %v3964_v34 }
 0xd00   : > { %v3306_v35 = vpop.f32.mrb[22].mxu1  ;;  %v3382_v36 = vpop.f32.mrb[32].mxu0 }
 0xd01   : > { %v4123_v37 = vpop.f32.mrb[23].mxu1  ;;  %v3383_v53 = vadd.f32 %v3382_v36, %v3306_v35  ;;  %v4136_v38 = vpop.f32.mrb[33].mxu0 }
 0xd04   : > { %v3457_v39 = vpop.f32.mrb[24].mxu1 }
 0xd05   : > { %4153 = vmatmul.mubr.msk.f32.vlgmr.msra.gmra.mrb[34].mxu0 %vm3233_vm1, %v3457_v39  ;;  %v4141_v40 = vpop.f32.mrb[25].mxu1 }
 0xdd8   : > { %v3539_v42 = vpop.f32.mrb[34].mxu0 }
 0xdd9   : > { %v3543_v44 = vadd.f32 %v3539_v42, %v3383_v53  ;;  %v4154_v45 = vpop.f32.mrb[35].mxu0 }
 0xddb   : > { %v3551_v46 = vadd.f32 %v3967_v43, %v3543_v44 }
 0xddd   : > { %v3552_v47 = vmax.f32 %v3551_v46, 0.0 }
 0xddf   : > { %4158 = vmatmul.mubr.msk.f32.vlgmr.msra.gmra.mrb[26].mxu1 %vm3555_vm2, %v3552_v47  ;;  %v3635_v49 = vrot.slane %v3552_v47, 1 }
 0xde0   : > { %4161 = vmatpush3.msk.msra.mxu1 %vm1429_vm5, %v3970_v48  ;;  %4162 = vmatprep.mubr.msk.f32.mxu1 %vm4517_vm7, %v4515_v25 }
 0xde7   : > { %4163 = vmatmul.mubr.msk.f32.vlgmr.msra.gmra.mrb[26].mxu1 %vm3555_vm2, %v3635_v49 }
 0xeba   : > { %v3707_v51 = vpop.f32.mrb[26].mxu1 }
 0xebb   : > { %v4392_v52 = vadd.f32 %v3707_v51, %v3553_v50  ;;  %v4164_v54 = vpop.f32.mrb[27].mxu1 }
 0xebd   : > { %3713 = vst.msk [vmem:[%s648_s30] sm:$0x1] %vm3712_vm3, %v4392_v52 }
 0xebe   : > { %4463 = shalt.err (!%p4460_p3)
}
 0xebf   : > { %s4464_s26 = scalar_lea.hbm %s5452_s0, 16  ;;  %s4468_s5 = scalar_lea.hbm %s5559_s4, 64 }
 0xec0   : > { %p4465_p4 = scmp.ne.s32.totalorder %s5452_s0, %s4464_s26  ;;  %p4469_p9 = scmp.lt.u32.totalorder %s5452_s0, %s5559_s4 }
 0xec1   : > { %p4470_p10 = scmp.lt.u32.totalorder %s4468_s5, %s4464_s26  ;;  %p4472_p12 = scmp.lt.u32.totalorder %s4464_s26, %s5452_s0 }
 0xec2   : > { %p4466_p7 = pnand %p4465_p4, %p4667_p5 }
 0xec3   : > { %p4471_p11 = por %p4470_p10, %p4469_p9 }
 0xec4   : > { %p4467_p8 = pneg %p4466_p7 }
 0xec5   : > { %p4473_p13 = por %p4472_p12, %p4471_p11 }
 0xec7   : > { %p4474_p0 = pnand %p4473_p13, %p4467_p8 }
 0xec9   : > { %4477 = shalt.err (!%p4474_p0)
}
 0xeca   : > { %4407 = dma.vmem_to_hbm [thread:$0]  (%p4667_p5), %s5454_s23, 16, %s5452_s0, %s3715_s27  }
 0xecb PF: > { %s5560_s6 = sld [smem:[#allocation7_spill]]  ;;  %s5561_s21 = sld [smem:[#allocation5_spill]] }
 0xed1   : > { %p4413_p1 = scmp.ge.s32.totalorder %s5560_s6, 2  ;;  %s3739_s29 = sand.u32 1, %s5561_s21  }
 0xed2   : > { %s3740_s30 = scalar_lea.sflag [#allocation3], %s3739_s29 }
 0xed3   : > { %p4410_p2 = pnand %p4413_p1, %p4671_p6 }
 0xed5   : > { %4495 = dma.done.wait (!%p4410_p2), %s3740_s30, 16  }
 0xed6   : > { %4497 = vsyncadd (!%p4410_p2), %s3740_s30, 4294967280  ;;  %s5563_s27 = sld [smem:[#allocation8_spill]]  ;;  %s5564_s26 = sld [smem:[#allocation6_spill]] }
 0xed7   : > { %s5565_s5 = sld [smem:[#allocation9_spill]]  ;;  %s5566_s2 = smov %s4504_s25 }
 0xedc   : > { %p31_p3 = scmp.ge.s32.totalorder %s5563_s27, 6   ;;  %s5567_s25 = smov %s5564_s26 }
 0xedd   : > { %s5568_s26 = smov %s5565_s5 }
 0xede   :  { %33 = sbr.rel (!%p31_p3) target bundleno = 13 (0xd), region = 162 }
 0xee5   :  { %3744 = vsyncpa [#allocation3], 1 }
 0xee6   :  { %3746 = vsyncpa [#allocation3 + $0x1], 1 }

</bundles_post_ra>
